<compile_context>
chip_gen: v7x
topology: tpu7x:2x2x1
jax: 0.10.0
libtpu: 0.0.40
codegen_flags: <defaults>
</compile_context>

<pallas_src>
import jax
import jax.numpy as jnp
from jax.experimental import pallas as pl
from jax.experimental.pallas import tpu as pltpu


_B_TILE = 1024     # max batch rows per grid step
_K_IN = 128        # conv-input contraction dim (81 padded to 128)
_HID = 1408        # conv-output / fused-fc input dim (1296 padded to 11*128)
_OUT = 128         # lane-dense output width (real width is 1)


# ----------------------------------------------------------------------------
# Fused kernel: conv(as matmul) + ReLU -> single folded fc matmul
# ----------------------------------------------------------------------------
def _fused_kernel(x_ref, wc_ref, bc_ref, wf_ref, bf_ref, o_ref):
    # x: (bt, 128)   wc: (128, 1408)  — padded rows/cols are zero.
    h = jnp.dot(x_ref[...], wc_ref[...], preferred_element_type=jnp.float32)
    h = jnp.maximum(h + bc_ref[...], 0.0)                     # (bt, 1408)
    # folded fc1∘fc2∘fc3: (1408, 128), only column 0 is real
    o_ref[...] = (jnp.dot(h, wf_ref[...], preferred_element_type=jnp.float32)
                  + bf_ref[...])


# ----------------------------------------------------------------------------
# Trace-time weight preparation (pure glue, constant w.r.t. activations)
# ----------------------------------------------------------------------------
def _conv_as_matrix(conv_w):
    """(16,1,3,3) conv -> (81, 1296) dense matrix.

    W[q, j] with q = hi*9 + wi (input pixel), j = c*81 + ho*9 + wo
    (torch's NCHW channel-major flatten order), Conv2d(padding=1) zero-padding
    semantics baked in.
    """
    w = conv_w.reshape(16, 3, 3)
    idx = jnp.arange(9)
    kh = idx[:, None] - idx[None, :] + 1          # (hi, ho)
    kw = idx[:, None] - idx[None, :] + 1          # (wi, wo)
    vh = (kh >= 0) & (kh < 3)
    vw = (kw >= 0) & (kw < 3)
    khc = jnp.clip(kh, 0, 2)
    kwc = jnp.clip(kw, 0, 2)
    # wm[c, hi, ho, wi, wo] = w[c, khc[hi,ho], kwc[wi,wo]]
    wm = w[:, khc[:, :, None, None], kwc[None, None, :, :]]       # (16,9,9,9,9)
    mask = (vh[:, :, None, None] & vw[None, None, :, :]).astype(w.dtype)
    wm = wm * mask[None]
    # -> (hi, wi, c, ho, wo) -> (81, 16*81)
    return wm.transpose(1, 3, 0, 2, 4).reshape(81, 16 * 81)


def init_params(key):
    """Deterministic PyTorch-style (uniform +-1/sqrt(fan_in)) init."""
    ks = jax.random.split(key, 8)

    def u(k, shape, fan_in):
        bound = 1.0 / jnp.sqrt(jnp.float32(fan_in))
        return jax.random.uniform(k, shape, jnp.float32, -bound, bound)

    return dict(
        conv_w=u(ks[0], (16, 1, 3, 3), 9),
        conv_b=u(ks[1], (16,), 9),
        fc1_w=u(ks[2], (81, 9 * 9 * 16), 9 * 9 * 16),
        fc1_b=u(ks[3], (81,), 9 * 9 * 16),
        fc2_w=u(ks[4], (81, 81), 81),
        fc2_b=u(ks[5], (81,), 81),
        fc3_w=u(ks[6], (1, 81), 81),
        fc3_b=u(ks[7], (1,), 81),
    )


# ----------------------------------------------------------------------------
# Forward
# ----------------------------------------------------------------------------
def model_13_forward(x, params):
    B = x.shape[0]
    assert x.shape[1:] == (1, 9, 9), "model_13 expects (B, 1, 9, 9) input"
    x_flat = x.astype(jnp.float32).reshape(B, 81)
    x_flat = jnp.pad(x_flat, ((0, 0), (0, _K_IN - 81)))        # lane-dense K=128

    # ---- conv as a dense matrix, padded to (128, 1408) ----
    wc = _conv_as_matrix(params["conv_w"])                     # (81, 1296)
    wc = jnp.pad(wc, ((0, _K_IN - 81), (0, _HID - 16 * 81)))
    bc = jnp.pad(jnp.repeat(params["conv_b"], 81),
                 (0, _HID - 16 * 81)).reshape(1, _HID)

    # ---- fold fc1 -> fc2 -> fc3 (purely linear chain) into one matrix ----
    wf = params["fc1_w"].T @ params["fc2_w"].T @ params["fc3_w"].T      # (1296, 1)
    bf = ((params["fc1_b"] @ params["fc2_w"].T + params["fc2_b"])
          @ params["fc3_w"].T + params["fc3_b"])                        # (1,)
    wf = jnp.pad(wf, ((0, _HID - 16 * 81), (0, _OUT - 1)))     # (1408, 128)
    bf = jnp.pad(bf, (0, _OUT - 1)).reshape(1, _OUT)

    # ---- batch tiling: no HBM batch padding (partial last block is masked);
    #      aim for >=2 grid steps so both v7x TensorCores get work ----
    if B <= 8:
        bt = B
    else:
        bt = min(_B_TILE, ((B + 1) // 2 + 7) // 8 * 8)
    grid = (pl.cdiv(B, bt),)

    flops = 2 * B * (_K_IN * _HID + _HID * _OUT)
    bytes_accessed = 4 * (B * _K_IN + B * _OUT
                          + _K_IN * _HID + _HID * _OUT + 2 * _HID + 2 * _OUT)

    out = pl.pallas_call(
        _fused_kernel,
        out_shape=jax.ShapeDtypeStruct((B, _OUT), jnp.float32),
        grid=grid,
        in_specs=[
            pl.BlockSpec((bt, _K_IN), lambda i: (i, 0)),       # x (tiled over batch)
            pl.BlockSpec((_K_IN, _HID), lambda i: (0, 0)),     # conv matrix
            pl.BlockSpec((1, _HID), lambda i: (0, 0)),         # conv bias (expanded)
            pl.BlockSpec((_HID, _OUT), lambda i: (0, 0)),      # folded fc matrix
            pl.BlockSpec((1, _OUT), lambda i: (0, 0)),         # folded fc bias
        ],
        out_specs=pl.BlockSpec((bt, _OUT), lambda i: (i, 0)),
        compiler_params=pltpu.CompilerParams(
            dimension_semantics=("parallel",)),
        cost_estimate=pl.CostEstimate(
            flops=flops, transcendentals=0, bytes_accessed=bytes_accessed),
    )(x_flat, wc, bc, wf, bf)

    # torch output shape: (B, 1, 1)
    return out[:, 0].reshape(B, 1, 1)


# ----------------------------------------------------------------------------
# Pure-JAX reference reproducing the PyTorch graph (validation only)
# ----------------------------------------------------------------------------
def _reference_forward(x, params):
    x = x.astype(jnp.float32)
    conv = jax.lax.conv_general_dilated(
        x, params["conv_w"], window_strides=(1, 1), padding=((1, 1), (1, 1)),
        dimension_numbers=("NCHW", "OIHW", "NCHW"),
    ) + params["conv_b"].reshape(1, 16, 1, 1)
    h = jnp.maximum(conv, 0.0).reshape(-1, 1, 9 * 9 * 16)
    h = h @ params["fc1_w"].T + params["fc1_b"]
    h = h @ params["fc2_w"].T + params["fc2_b"]
    h = h @ params["fc3_w"].T + params["fc3_b"]
    return h


if __name__ == "__main__":
    key = jax.random.PRNGKey(0)
    k_x, k_p = jax.random.split(key)

    B = 2
    x = jax.random.normal(k_x, (B, 1, 9, 9), dtype=jnp.float32)
    params = init_params(k_p)

    out = jax.block_until_ready(model_13_forward(x, params))
    ref = jax.block_until_ready(_reference_forward(x, params))

    assert out.shape == (B, 1, 1), out.shape
    assert jnp.allclose(out, ref, atol=1e-4, rtol=1e-4), (out, ref)
    print("KERNEL_OK")
</pallas_src>

<mosaic_0001>
module attributes {stable_mosaic.version = 11 : i64} {
  func.func @_fused_kernel(%arg0: i32, %arg1: memref<2x128xf32, #tpu.memory_space<vmem>>, %arg2: memref<128x1408xf32, #tpu.memory_space<vmem>>, %arg3: memref<1x1408xf32, #tpu.memory_space<vmem>>, %arg4: memref<1408x128xf32, #tpu.memory_space<vmem>>, %arg5: memref<1x128xf32, #tpu.memory_space<vmem>>, %arg6: memref<2x128xf32, #tpu.memory_space<vmem>>) attributes {dimension_semantics = [#tpu.dimension_semantics<parallel>], iteration_bounds = array<i64: 1>, scalar_prefetch = 0 : i64, scratch_operands = 0 : i64, tpu.core_type = #tpu.core_type<tc>, window_params = [{transform_indices = @transform_0, window_bounds = array<i64: 2, 128>}, {pipeline_mode = #tpu.pipeline_mode<synchronous>, transform_indices = @transform_1, window_bounds = array<i64: 128, 1408>}, {pipeline_mode = #tpu.pipeline_mode<synchronous>, transform_indices = @transform_2, window_bounds = array<i64: 1, 1408>}, {pipeline_mode = #tpu.pipeline_mode<synchronous>, transform_indices = @transform_3, window_bounds = array<i64: 1408, 128>}, {pipeline_mode = #tpu.pipeline_mode<synchronous>, transform_indices = @transform_4, window_bounds = array<i64: 1, 128>}, {transform_indices = @transform_5, window_bounds = array<i64: 2, 128>}]} {
    %c0 = arith.constant 0 : index
    %c0_0 = arith.constant 0 : index
    %0 = vector.load %arg1[%c0, %c0_0] : memref<2x128xf32, #tpu.memory_space<vmem>>, vector<2x128xf32>
    %c0_1 = arith.constant 0 : index
    %c0_2 = arith.constant 0 : index
    %1 = vector.load %arg2[%c0_1, %c0_2] : memref<128x1408xf32, #tpu.memory_space<vmem>>, vector<128x1408xf32>
    %cst = arith.constant dense<0.000000e+00> : vector<2x1408xf32>
    %2 = tpu.matmul %0, %1, %cst {dimension_numbers = #tpu.dot_dimension_numbers<[1], [0], [0], [1], [0, 0, 1, 1], [], []>} : vector<2x128xf32>, vector<128x1408xf32>, vector<2x1408xf32> -> vector<2x1408xf32>
    %c0_3 = arith.constant 0 : index
    %c0_4 = arith.constant 0 : index
    %3 = vector.load %arg3[%c0_3, %c0_4] : memref<1x1408xf32, #tpu.memory_space<vmem>>, vector<1x1408xf32>
    %4 = vector.broadcast %3 : vector<1x1408xf32> to vector<2x1408xf32>
    %5 = arith.addf %2, %4 : vector<2x1408xf32>
    %cst_5 = arith.constant 0.000000e+00 : f32
    %6 = vector.broadcast %cst_5 : f32 to vector<2x1408xf32>
    %7 = arith.maximumf %5, %6 : vector<2x1408xf32>
    %c0_6 = arith.constant 0 : index
    %c0_7 = arith.constant 0 : index
    %8 = vector.load %arg4[%c0_6, %c0_7] : memref<1408x128xf32, #tpu.memory_space<vmem>>, vector<1408x128xf32>
    %cst_8 = arith.constant dense<0.000000e+00> : vector<2x128xf32>
    %9 = tpu.matmul %7, %8, %cst_8 {dimension_numbers = #tpu.dot_dimension_numbers<[1], [0], [0], [1], [0, 0, 1, 1], [], []>} : vector<2x1408xf32>, vector<1408x128xf32>, vector<2x128xf32> -> vector<2x128xf32>
    %c0_9 = arith.constant 0 : index
    %c0_10 = arith.constant 0 : index
    %10 = vector.load %arg5[%c0_9, %c0_10] : memref<1x128xf32, #tpu.memory_space<vmem>>, vector<1x128xf32>
    %11 = vector.broadcast %10 : vector<1x128xf32> to vector<2x128xf32>
    %12 = arith.addf %9, %11 : vector<2x128xf32>
    %c0_11 = arith.constant 0 : index
    %c0_12 = arith.constant 0 : index
    %13 = vector.load %arg6[%c0_11, %c0_12] : memref<2x128xf32, #tpu.memory_space<vmem>>, vector<2x128xf32>
    tpu.vector_store %arg6[%c0_11, %c0_12], %12 {strides = array<i32>} : memref<2x128xf32, #tpu.memory_space<vmem>>, vector<2x128xf32>,
    return
  }
  func.func @transform_0(%arg0: i32) -> (i32, i32) {
    %c0_i32 = arith.constant 0 : i32
    %c0_i32_0 = arith.constant 0 : i32
    return %arg0, %c0_i32 : i32, i32
  }
  func.func @transform_1(%arg0: i32) -> (i32, i32) {
    %c0_i32 = arith.constant 0 : i32
    %c0_i32_0 = arith.constant 0 : i32
    %c0_i32_1 = arith.constant 0 : i32
    return %c0_i32, %c0_i32_0 : i32, i32
  }
  func.func @transform_2(%arg0: i32) -> (i32, i32) {
    %c0_i32 = arith.constant 0 : i32
    %c0_i32_0 = arith.constant 0 : i32
    %c0_i32_1 = arith.constant 0 : i32
    return %c0_i32, %c0_i32_0 : i32, i32
  }
  func.func @transform_3(%arg0: i32) -> (i32, i32) {
    %c0_i32 = arith.constant 0 : i32
    %c0_i32_0 = arith.constant 0 : i32
    %c0_i32_1 = arith.constant 0 : i32
    return %c0_i32, %c0_i32_0 : i32, i32
  }
  func.func @transform_4(%arg0: i32) -> (i32, i32) {
    %c0_i32 = arith.constant 0 : i32
    %c0_i32_0 = arith.constant 0 : i32
    %c0_i32_1 = arith.constant 0 : i32
    return %c0_i32, %c0_i32_0 : i32, i32
  }
  func.func @transform_5(%arg0: i32) -> (i32, i32) {
    %c0_i32 = arith.constant 0 : i32
    %c0_i32_0 = arith.constant 0 : i32
    return %arg0, %c0_i32 : i32, i32
  }
}

</mosaic_0001>

<bundles_post_ra>
// kernel: tpu_custom_call.1
= control target key start
LH: loop header
LB: loop body
LE: loop exit
PB: predicated region body
PF: predicated region fallthrough
CT: control target
= control target key end

     0   :  { %10 = vsyncpa [#allocation3], 0  ;;  %s2313_s0 = inlined_call_operand.hbm [shape: f32[2,128], index: 0, kind: input, shape index: {}]   ;;  %s2314_s1 = inlined_call_operand.hbm [shape: f32[128,1408], index: 1, kind: input, shape index: {}]   ;;  %s2315_s2 = inlined_call_operand.hbm [shape: f32[1,1408], index: 2, kind: input, shape index: {}]   ;;  %s2316_s3 = inlined_call_operand.hbm [shape: f32[1408,128], index: 3, kind: input, shape index: {}]   ;;  %s2317_s4 = inlined_call_operand.vmem [shape: f32[1,128], index: 4, kind: input, shape index: {}]   ;;  %s2318_s5 = inlined_call_operand.hbm [shape: f32[2,128], index: 5, kind: output, shape index: {}]  }
   0x1   :  { %11 = vsyncpa [#allocation6], 0 }
   0x2   :  { %12 = vsyncpa [#allocation9], 0 }
   0x3   :  { %13 = vsyncpa [#allocation4], 0  ;;  %s2143_s18 = smov [#allocation5]   ;;  %s2025_s22 = scalar_lea.hbm %s2314_s1, 22528 }
   0x4   :  { %s29_s19 = sshll.u32 %s2143_s18, 4  ;;  %p2026_p0 = scmp.ne.s32.totalorder %s2314_s1, %s2025_s22  ;;  %s30_s19 = int_to_ptr.vmem [resolvable:$true] %s29_s19 }
   0x5   :  { %p2029_p1 = scmp.lt.u32.totalorder %s2025_s22, %s2314_s1 }
   0x7   :  { %p2031_p2 = pnand %p2029_p1, %p2026_p0 }
   0x9   :  { %2034 = shalt.err (!%p2031_p2)
}
   0xa   :  { %s2035_s27 = scalar_lea.vmem %s30_s19, 22528  ;;  %p2040_p4 = scmp.lt.s32.totalorder %s30_s19, %s30_s19 }
   0xb   :  { %p2036_p3 = scmp.ne.s32.totalorder %s30_s19, %s2035_s27  ;;  %p2041_p5 = scmp.lt.s32.totalorder %s2035_s27, %s2035_s27 }
   0xd   :  { %p2042_p6 = por %p2041_p5, %p2040_p4 }
   0xf   :  { %p2043_p7 = pnand %p2042_p6, %p2036_p3 }
  0x11   :  { %2046 = shalt.err (!%p2043_p7)
}
  0x12   :  { %s2144_s28 = smov 1408   ;;  %s2145_s29 = smov 88  }
  0x13   :  { %35 = dma.hbm_to_vmem [thread:$0]  %s2314_s1, 22528, %s30_s19, [#allocation6], %s2144_s28, %s2144_s28, %s2145_s29  }
  0x14   :  { %s2146_s7 = smov [#allocation2]   ;;  %s2147_s9 = smov [#allocation7]  }
  0x15   :  { %s20_s8 = sshll.u32 %s2146_s7, 4  ;;  %s42_s10 = sshll.u32 %s2147_s9, 4  ;;  %s21_s8 = int_to_ptr.vmem [resolvable:$true] %s20_s8  ;;  %s43_s10 = int_to_ptr.vmem [resolvable:$true] %s42_s10 }
  0x16   :  { %s2047_s13 = scalar_lea.hbm %s2313_s0, 32 }
  0x17   :  { %p2048_p8 = scmp.ne.s32.totalorder %s2313_s0, %s2047_s13  ;;  %p2051_p9 = scmp.lt.u32.totalorder %s2047_s13, %s2313_s0 }
  0x19   :  { %p2053_p10 = pnand %p2051_p9, %p2048_p8 }
  0x1b   :  { %2056 = shalt.err (!%p2053_p10)
}
  0x1c   :  { %s2057_s1 = scalar_lea.vmem %s21_s8, 32  ;;  %p2062_p12 = scmp.lt.s32.totalorder %s21_s8, %s21_s8 }
  0x1d   :  { %p2058_p11 = scmp.ne.s32.totalorder %s21_s8, %s2057_s1  ;;  %p2063_p13 = scmp.lt.s32.totalorder %s2057_s1, %s2057_s1 }
  0x1f   :  { %p2064_p0 = por %p2063_p13, %p2062_p12 }
  0x21   :  { %p2065_p1 = pnand %p2064_p0, %p2058_p11 }
  0x23   :  { %2068 = shalt.err (!%p2065_p1)
}
  0x24   :  { %23 = dma.hbm_to_vmem [thread:$0]  %s2313_s0, 32, %s21_s8, [#allocation3]  }
  0x25   :  { %s2069_s22 = scalar_lea.hbm %s2315_s2, 176 }
  0x26   :  { %p2070_p2 = scmp.ne.s32.totalorder %s2315_s2, %s2069_s22  ;;  %p2073_p3 = scmp.lt.u32.totalorder %s2069_s22, %s2315_s2 }
  0x28   :  { %p2075_p4 = pnand %p2073_p3, %p2070_p2 }
  0x2a   :  { %2078 = shalt.err (!%p2075_p4)
}
  0x2b   :  { %s2079_s27 = scalar_lea.vmem %s43_s10, 176  ;;  %s2083_s28 = scalar_lea.vmem %s43_s10, 192 }
  0x2c   :  { %p2080_p5 = scmp.ne.s32.totalorder %s43_s10, %s2079_s27  ;;  %p2084_p6 = scmp.lt.s32.totalorder %s43_s10, %s43_s10 }
  0x2d   :  { %p2085_p7 = scmp.lt.s32.totalorder %s2083_s28, %s2079_s27 }
  0x2f   :  { %p2086_p8 = por %p2085_p7, %p2084_p6 }
  0x31   :  { %p2087_p9 = pnand %p2086_p8, %p2080_p5 }
  0x33   :  { %2090 = shalt.err (!%p2087_p9)
}
  0x34   :  { %45 = dma.hbm_to_vmem [thread:$0]  %s2315_s2, 176, %s43_s10, [#allocation6]  }
  0x35   :  { %s2148_s30 = smov [#allocation8]   ;;  %s2091_s9 = scalar_lea.hbm %s2316_s3, 22528 }
  0x36   :  { %s51_s6 = sshll.u32 %s2148_s30, 4  ;;  %p2092_p10 = scmp.ne.s32.totalorder %s2316_s3, %s2091_s9  ;;  %s52_s6 = int_to_ptr.vmem [resolvable:$true] %s51_s6 }
  0x37   :  { %p2095_p11 = scmp.lt.u32.totalorder %s2091_s9, %s2316_s3 }
  0x39   :  { %p2097_p12 = pnand %p2095_p11, %p2092_p10 }
  0x3b   :  { %2100 = shalt.err (!%p2097_p12)
}
  0x3c   :  { %s2101_s15 = scalar_lea.vmem %s52_s6, 22528  ;;  %p2106_p0 = scmp.lt.s32.totalorder %s52_s6, %s52_s6 }
  0x3d   :  { %p2102_p13 = scmp.ne.s32.totalorder %s52_s6, %s2101_s15  ;;  %p2107_p1 = scmp.lt.s32.totalorder %s2101_s15, %s2101_s15 }
  0x3f   :  { %p2108_p2 = por %p2107_p1, %p2106_p0 }
  0x41   :  { %p2109_p3 = pnand %p2108_p2, %p2102_p13 }
  0x43   :  { %2112 = shalt.err (!%p2109_p3)
}
  0x44   :  { %s2149_s2 = smov 128   ;;  %s2150_s10 = smov 8  }
  0x45   :  { %57 = dma.hbm_to_vmem [thread:$0]  %s2316_s3, 22528, %s52_s6, [#allocation9], %s2149_s2, %s2149_s2, %s2150_s10  }
  0x46   :  { %2135 = dma.done.wait [#allocation3], 32  }
  0x47   :  { %2136 = vsyncadd [#allocation3], 4294967264 }
  0x48   :  { %2137 = dma.done.wait [#allocation6], 22704  }
  0x49   :  { %2138 = vsyncadd [#allocation6], 4294944592 }
  0x4a   :  { %2139 = dma.done.wait [#allocation9], 22528  }
  0x4b   :  { %2140 = vsyncadd [#allocation9], 4294944768  ;;  %v2151_v0 = vmov 0.0   ;;  %v74_v1 = vld [vmem:[#allocation5 + $0x8] sm:$0xff]  ;;  %v85_v2 = vld [vmem:[#allocation5 + $0x60] sm:$0xff]  ;;  %vm2153_vm0 = vmmov 0  }
  0x4c   :  { %372 = vmatprep.mubr.f32.mxu0 %v2151_v0  ;;  %443 = vmatprep.mubr.f32.mxu1 %v2151_v0  ;;  %v73_v3 = vld [vmem:[#allocation5] sm:$0xff]  ;;  %v1645_v4 = vpack.c.bf16 %v85_v2, %v74_v1  ;;  %v84_v5 = vld [vmem:[#allocation5 + $0x58] sm:$0xff]  ;;  %v87_v7 = vld [vmem:[#allocation5 + $0x70] sm:$0xff] }
  0x4d   :  { %v76_v6 = vld [vmem:[#allocation5 + $0x18] sm:$0xff]  ;;  %v1647_v8 = vpack.c.bf16 %v84_v5, %v73_v3  ;;  %v75_v10 = vld [vmem:[#allocation5 + $0x10] sm:$0xff]  ;;  %v86_v11 = vld [vmem:[#allocation5 + $0x68] sm:$0xff] }
  0x4e   :  { %v1677_v9 = vpack.c.bf16 %v87_v7, %v76_v6  ;;  %v96_v12 = vld [vmem:[#allocation5 + $0xb8] sm:$0xff]  ;;  %1646 = vmatprep.subr.bf16.mxu0 %v1645_v4  ;;  %v1679_v13 = vpack.c.bf16 %v86_v11, %v75_v10  ;;  %v107_v14 = vld [vmem:[#allocation5 + $0x110] sm:$0xff]  ;;  %v106_v16 = vld [vmem:[#allocation5 + $0x108] sm:$0xff] }
  0x4f   :  { %v95_v15 = vld [vmem:[#allocation5 + $0xb0] sm:$0xff]  ;;  %1648 = vmatpush1.bf16.msra.mxu0 %v1647_v8  ;;  %v1649_v17 = vpack.c.bf16 %v107_v14, %v96_v12  ;;  %v98_v19 = vld [vmem:[#allocation5 + $0xc8] sm:$0xff]  ;;  %v109_v20 = vld [vmem:[#allocation5 + $0x120] sm:$0xff] }
  0x50   :  { %1678 = vmatprep.subr.bf16.mxu1 %v1677_v9  ;;  %v1651_v18 = vpack.c.bf16 %v106_v16, %v95_v15  ;;  %v97_v21 = vld [vmem:[#allocation5 + $0xc0] sm:$0xff]  ;;  %v1681_v22 = vpack.c.bf16 %v109_v20, %v98_v19  ;;  %v108_v23 = vld [vmem:[#allocation5 + $0x118] sm:$0xff]  ;;  %v118_v24 = vld [vmem:[#allocation5 + $0x168] sm:$0xff] }
  0x51   :  { %1680 = vmatpush1.bf16.msra.mxu1 %v1679_v13  ;;  %v129_v25 = vld [vmem:[#allocation5 + $0x1c0] sm:$0xff]  ;;  %1650 = vmatprep.subr.bf16.mxu0 %v1649_v17  ;;  %v1683_v26 = vpack.c.bf16 %v108_v23, %v97_v21  ;;  %v128_v29 = vld [vmem:[#allocation5 + $0x1b8] sm:$0xff]  ;;  %v131_v31 = vld [vmem:[#allocation5 + $0x1d0] sm:$0xff] }
  0x52   :  { %v1653_v27 = vpack.c.bf16 %v129_v25, %v118_v24  ;;  %v117_v28 = vld [vmem:[#allocation5 + $0x160] sm:$0xff]  ;;  %v120_v30 = vld [vmem:[#allocation5 + $0x178] sm:$0xff]  ;;  %1682 = vmatprep.subr.bf16.mxu1 %v1681_v22  ;;  %v119_v32 = vld [vmem:[#allocation5 + $0x170] sm:$0xff] }
  0x53   :  { %v130_v33 = vld [vmem:[#allocation5 + $0x1c8] sm:$0xff]  ;;  %1652 = vmatpush1.bf16.msra.mxu0 %v1651_v18  ;;  %v1655_v34 = vpack.c.bf16 %v128_v29, %v117_v28  ;;  %v1685_v35 = vpack.c.bf16 %v131_v31, %v120_v30  ;;  %v140_v36 = vld [vmem:[#allocation5 + $0x218] sm:$0xff]  ;;  %v151_v37 = vld [vmem:[#allocation5 + $0x270] sm:$0xff] }
  0x54   :  { %v139_v38 = vld [vmem:[#allocation5 + $0x210] sm:$0xff]  ;;  %1654 = vmatprep.subr.bf16.mxu0 %v1653_v27  ;;  %v1687_v39 = vpack.c.bf16 %v130_v33, %v119_v32  ;;  %v1657_v40 = vpack.c.bf16 %v151_v37, %v140_v36  ;;  %v150_v41 = vld [vmem:[#allocation5 + $0x268] sm:$0xff]  ;;  %v153_v43 = vld [vmem:[#allocation5 + $0x280] sm:$0xff] }
  0x55   :  { %1684 = vmatpush1.bf16.msra.mxu1 %v1683_v26  ;;  %v142_v42 = vld [vmem:[#allocation5 + $0x228] sm:$0xff]  ;;  %v141_v45 = vld [vmem:[#allocation5 + $0x220] sm:$0xff]  ;;  %v152_v46 = vld [vmem:[#allocation5 + $0x278] sm:$0xff]  ;;  %v1659_v49 = vpack.c.bf16 %v150_v41, %v139_v38 }
  0x56   :  { %1686 = vmatprep.subr.bf16.mxu1 %v1685_v35  ;;  %v1689_v44 = vpack.c.bf16 %v153_v43, %v142_v42  ;;  %v162_v47 = vld [vmem:[#allocation5 + $0x2c8] sm:$0xff]  ;;  %v173_v48 = vld [vmem:[#allocation5 + $0x320] sm:$0xff]  ;;  %v164_v50 = vld [vmem:[#allocation5 + $0x2d8] sm:$0xff]  ;;  %v1691_v52 = vpack.c.bf16 %v152_v46, %v141_v45 }
  0x57   :  { %1656 = vmatpush1.bf16.msra.mxu0 %v1655_v34  ;;  %v175_v51 = vld [vmem:[#allocation5 + $0x330] sm:$0xff]  ;;  %v1661_v53 = vpack.c.bf16 %v173_v48, %v162_v47  ;;  %v161_v54 = vld [vmem:[#allocation5 + $0x2c0] sm:$0xff]  ;;  %v172_v55 = vld [vmem:[#allocation5 + $0x318] sm:$0xff] }
  0x58   :  { %1658 = vmatprep.subr.bf16.mxu0 %v1657_v40  ;;  %v163_v56 = vld [vmem:[#allocation5 + $0x2d0] sm:$0xff]  ;;  %v1693_v57 = vpack.c.bf16 %v175_v51, %v164_v50  ;;  %v174_v58 = vld [vmem:[#allocation5 + $0x328] sm:$0xff]  ;;  %v184_v59 = vld [vmem:[#allocation5 + $0x378] sm:$0xff]  ;;  %v1663_v63 = vpack.c.bf16 %v172_v55, %v161_v54 }
  0x59   :  { %1688 = vmatpush1.bf16.msra.mxu1 %v1687_v39  ;;  %v195_v60 = vld [vmem:[#allocation5 + $0x3d0] sm:$0xff]  ;;  %v186_v61 = vld [vmem:[#allocation5 + $0x388] sm:$0xff]  ;;  %v197_v62 = vld [vmem:[#allocation5 + $0x3e0] sm:$0xff]  ;;  %v1695_v1 = vpack.c.bf16 %v174_v58, %v163_v56 }
  0x5a   :  { %1690 = vmatprep.subr.bf16.mxu1 %v1689_v44  ;;  %v1665_v2 = vpack.c.bf16 %v195_v60, %v184_v59  ;;  %v183_v3 = vld [vmem:[#allocation5 + $0x370] sm:$0xff]  ;;  %v194_v4 = vld [vmem:[#allocation5 + $0x3c8] sm:$0xff]  ;;  %v185_v5 = vld [vmem:[#allocation5 + $0x380] sm:$0xff]  ;;  %v1697_v6 = vpack.c.bf16 %v197_v62, %v186_v61 }
  0x5b   :  { %1660 = vmatpush1.bf16.msra.mxu0 %v1659_v49  ;;  %v196_v7 = vld [vmem:[#allocation5 + $0x3d8] sm:$0xff]  ;;  %v206_v8 = vld [vmem:[#allocation5 + $0x428] sm:$0xff]  ;;  %v217_v9 = vld [vmem:[#allocation5 + $0x480] sm:$0xff]  ;;  %v1667_v12 = vpack.c.bf16 %v194_v4, %v183_v3 }
  0x5c   :  { %1662 = vmatprep.subr.bf16.mxu0 %v1661_v53  ;;  %v208_v10 = vld [vmem:[#allocation5 + $0x438] sm:$0xff]  ;;  %v219_v11 = vld [vmem:[#allocation5 + $0x490] sm:$0xff]  ;;  %v1699_v13 = vpack.c.bf16 %v196_v7, %v185_v5  ;;  %v1669_v14 = vpack.c.bf16 %v217_v9, %v206_v8  ;;  %v205_v15 = vld [vmem:[#allocation5 + $0x420] sm:$0xff] }
  0x5d   :  { %1692 = vmatpush1.bf16.msra.mxu1 %v1691_v52  ;;  %v216_v16 = vld [vmem:[#allocation5 + $0x478] sm:$0xff]  ;;  %v207_v17 = vld [vmem:[#allocation5 + $0x430] sm:$0xff]  ;;  %v1701_v18 = vpack.c.bf16 %v219_v11, %v208_v10  ;;  %v218_v19 = vld [vmem:[#allocation5 + $0x488] sm:$0xff] }
  0x5e   :  { %1694 = vmatprep.subr.bf16.mxu1 %v1693_v57  ;;  %v228_v20 = vld [vmem:[#allocation5 + $0x4d8] sm:$0xff]  ;;  %v239_v21 = vld [vmem:[#allocation5 + $0x530] sm:$0xff]  ;;  %v230_v22 = vld [vmem:[#allocation5 + $0x4e8] sm:$0xff]  ;;  %v1671_v24 = vpack.c.bf16 %v216_v16, %v205_v15  ;;  %v1703_v25 = vpack.c.bf16 %v218_v19, %v207_v17 }
  0x5f   :  { %1664 = vmatpush1.bf16.msra.mxu0 %v1663_v63  ;;  %v241_v23 = vld [vmem:[#allocation5 + $0x540] sm:$0xff]  ;;  %v1673_v26 = vpack.c.bf16 %v239_v21, %v228_v20  ;;  %v227_v27 = vld [vmem:[#allocation5 + $0x4d0] sm:$0xff]  ;;  %v238_v28 = vld [vmem:[#allocation5 + $0x528] sm:$0xff] }
  0x60   :  { %1666 = vmatprep.subr.bf16.mxu0 %v1665_v2  ;;  %v229_v29 = vld [vmem:[#allocation5 + $0x4e0] sm:$0xff]  ;;  %v1705_v30 = vpack.c.bf16 %v241_v23, %v230_v22  ;;  %v240_v31 = vld [vmem:[#allocation5 + $0x538] sm:$0xff]  ;;  %v78_v32 = vld [vmem:[#allocation5 + $0x28] sm:$0xff]  ;;  %v1675_v36 = vpack.c.bf16 %v238_v28, %v227_v27 }
  0x61   :  { %1696 = vmatpush1.bf16.msra.mxu1 %v1695_v1  ;;  %v89_v33 = vld [vmem:[#allocation5 + $0x80] sm:$0xff]  ;;  %v80_v34 = vld [vmem:[#allocation5 + $0x38] sm:$0xff]  ;;  %v91_v35 = vld [vmem:[#allocation5 + $0x90] sm:$0xff]  ;;  %v1707_v37 = vpack.c.bf16 %v240_v31, %v229_v29 }
  0x62   :  { %1698 = vmatprep.subr.bf16.mxu1 %v1697_v6  ;;  %v1709_v38 = vpack.c.bf16 %v89_v33, %v78_v32  ;;  %v77_v39 = vld [vmem:[#allocation5 + $0x20] sm:$0xff]  ;;  %v88_v40 = vld [vmem:[#allocation5 + $0x78] sm:$0xff]  ;;  %v79_v41 = vld [vmem:[#allocation5 + $0x30] sm:$0xff]  ;;  %v1741_v42 = vpack.c.bf16 %v91_v35, %v80_v34 }
  0x63   :  { %1668 = vmatpush1.bf16.msra.mxu0 %v1667_v12  ;;  %v90_v43 = vld [vmem:[#allocation5 + $0x88] sm:$0xff]  ;;  %v100_v44 = vld [vmem:[#allocation5 + $0xd8] sm:$0xff]  ;;  %v111_v45 = vld [vmem:[#allocation5 + $0x130] sm:$0xff]  ;;  %v1711_v49 = vpack.c.bf16 %v88_v40, %v77_v39 }
  0x64   :  { %1670 = vmatprep.subr.bf16.mxu0 %v1669_v14  ;;  %v102_v46 = vld [vmem:[#allocation5 + $0xe8] sm:$0xff]  ;;  %v113_v47 = vld [vmem:[#allocation5 + $0x140] sm:$0xff]  ;;  %v2235_v48 = vld [vmem:[#allocation2] sm:$0x3]  ;;  %v1743_v50 = vpack.c.bf16 %v90_v43, %v79_v41  ;;  %v1713_v51 = vpack.c.bf16 %v111_v45, %v100_v44 }
  0x65   :  { %1700 = vmatpush1.bf16.msra.mxu1 %v1699_v13  ;;  %v99_v52 = vld [vmem:[#allocation5 + $0xd0] sm:$0xff]  ;;  %v110_v53 = vld [vmem:[#allocation5 + $0x128] sm:$0xff]  ;;  %v101_v54 = vld [vmem:[#allocation5 + $0xe0] sm:$0xff]  ;;  %v1745_v55 = vpack.c.bf16 %v113_v47, %v102_v46 }
  0x66   :  { %1702 = vmatprep.subr.bf16.mxu1 %v1701_v18  ;;  %v112_v56 = vld [vmem:[#allocation5 + $0x138] sm:$0xff]  ;;  %v122_v57 = vld [vmem:[#allocation5 + $0x188] sm:$0xff]  ;;  %v133_v58 = vld [vmem:[#allocation5 + $0x1e0] sm:$0xff]  ;;  %v1715_v61 = vpack.c.bf16 %v110_v53, %v99_v52 }
  0x67   :  { %1672 = vmatpush1.bf16.msra.mxu0 %v1671_v24  ;;  %v124_v59 = vld [vmem:[#allocation5 + $0x198] sm:$0xff]  ;;  %v135_v60 = vld [vmem:[#allocation5 + $0x1f0] sm:$0xff]  ;;  %v1747_v62 = vpack.c.bf16 %v112_v56, %v101_v54  ;;  %v1717_v63 = vpack.c.bf16 %v133_v58, %v122_v57  ;;  %v121_v1 = vld [vmem:[#allocation5 + $0x180] sm:$0xff] }
  0x68   :  { %1674 = vmatprep.subr.bf16.mxu0 %v1673_v26  ;;  %v132_v2 = vld [vmem:[#allocation5 + $0x1d8] sm:$0xff]  ;;  %v123_v3 = vld [vmem:[#allocation5 + $0x190] sm:$0xff]  ;;  %v1749_v4 = vpack.c.bf16 %v135_v60, %v124_v59  ;;  %v134_v5 = vld [vmem:[#allocation5 + $0x1e8] sm:$0xff] }
  0x69   :  { %1704 = vmatpush1.bf16.msra.mxu1 %v1703_v25  ;;  %v144_v6 = vld [vmem:[#allocation5 + $0x238] sm:$0xff]  ;;  %v155_v7 = vld [vmem:[#allocation5 + $0x290] sm:$0xff]  ;;  %v146_v8 = vld [vmem:[#allocation5 + $0x248] sm:$0xff]  ;;  %v1719_v10 = vpack.c.bf16 %v132_v2, %v121_v1  ;;  %v1751_v11 = vpack.c.bf16 %v134_v5, %v123_v3 }
  0x6a   :  { %1706 = vmatprep.subr.bf16.mxu1 %v1705_v30  ;;  %v157_v9 = vld [vmem:[#allocation5 + $0x2a0] sm:$0xff]  ;;  %v1721_v12 = vpack.c.bf16 %v155_v7, %v144_v6  ;;  %v143_v13 = vld [vmem:[#allocation5 + $0x230] sm:$0xff]  ;;  %v154_v14 = vld [vmem:[#allocation5 + $0x288] sm:$0xff] }
  0x6b   :  { %1676 = vmatpush1.bf16.msra.mxu0 %v1675_v36  ;;  %v145_v15 = vld [vmem:[#allocation5 + $0x240] sm:$0xff]  ;;  %v1753_v16 = vpack.c.bf16 %v157_v9, %v146_v8  ;;  %v156_v17 = vld [vmem:[#allocation5 + $0x298] sm:$0xff]  ;;  %v166_v18 = vld [vmem:[#allocation5 + $0x2e8] sm:$0xff]  ;;  %v1723_v22 = vpack.c.bf16 %v154_v14, %v143_v13 }
  0x6c   :  { %1710 = vmatprep.subr.bf16.mxu0 %v1709_v38  ;;  %v177_v19 = vld [vmem:[#allocation5 + $0x340] sm:$0xff]  ;;  %v168_v20 = vld [vmem:[#allocation5 + $0x2f8] sm:$0xff]  ;;  %v179_v21 = vld [vmem:[#allocation5 + $0x350] sm:$0xff]  ;;  %v1755_v23 = vpack.c.bf16 %v156_v17, %v145_v15 }
  0x6d   :  { %1708 = vmatpush1.bf16.msra.mxu1 %v1707_v37  ;;  %v1725_v24 = vpack.c.bf16 %v177_v19, %v166_v18  ;;  %v165_v25 = vld [vmem:[#allocation5 + $0x2e0] sm:$0xff]  ;;  %v176_v26 = vld [vmem:[#allocation5 + $0x338] sm:$0xff]  ;;  %v167_v27 = vld [vmem:[#allocation5 + $0x2f0] sm:$0xff]  ;;  %v1757_v28 = vpack.c.bf16 %v179_v21, %v168_v20  ;;  %v2152_v21 = vmov 0.0|0.0  }
  0x6e   :  { %1742 = vmatprep.subr.bf16.mxu1 %v1741_v42  ;;  %373 = vmatmul.mubr.f32.vlgmr.msra.gmra.mrb[0].mxu0 %v2235_v48  ;;  %v178_v29 = vld [vmem:[#allocation5 + $0x348] sm:$0xff]  ;;  %v188_v30 = vld [vmem:[#allocation5 + $0x398] sm:$0xff]  ;;  %v199_v31 = vld [vmem:[#allocation5 + $0x3f0] sm:$0xff]  ;;  %v1727_v34 = vpack.c.bf16 %v176_v26, %v165_v25 }
  0x6f   :  { %1712 = vmatpush1.bf16.msra.mxu0 %v1711_v49  ;;  %514 = vmatprep.mubr.f32.mxu0 %v2151_v0  ;;  %v190_v32 = vld [vmem:[#allocation5 + $0x3a8] sm:$0xff]  ;;  %v201_v33 = vld [vmem:[#allocation5 + $0x400] sm:$0xff]  ;;  %v1759_v35 = vpack.c.bf16 %v178_v29, %v167_v27  ;;  %v1729_v36 = vpack.c.bf16 %v199_v31, %v188_v30  ;;  %v187_v37 = vld [vmem:[#allocation5 + $0x390] sm:$0xff] }
  0x70   :  { %444 = vmatmul.mubr.f32.vlgmr.msra.gmra.mrb[0].mxu1 %v2235_v48  ;;  %1714 = vmatprep.subr.bf16.mxu0 %v1713_v51  ;;  %v198_v38 = vld [vmem:[#allocation5 + $0x3e8] sm:$0xff]  ;;  %v189_v39 = vld [vmem:[#allocation5 + $0x3a0] sm:$0xff]  ;;  %v1761_v40 = vpack.c.bf16 %v201_v33, %v190_v32  ;;  %v200_v41 = vld [vmem:[#allocation5 + $0x3f8] sm:$0xff] }
  0x71   :  { %1744 = vmatpush1.bf16.msra.mxu1 %v1743_v50  ;;  %585 = vmatprep.mubr.f32.mxu1 %v2151_v0  ;;  %v210_v42 = vld [vmem:[#allocation5 + $0x448] sm:$0xff]  ;;  %v221_v43 = vld [vmem:[#allocation5 + $0x4a0] sm:$0xff]  ;;  %v212_v44 = vld [vmem:[#allocation5 + $0x458] sm:$0xff]  ;;  %v1731_v46 = vpack.c.bf16 %v198_v38, %v187_v37  ;;  %v1763_v47 = vpack.c.bf16 %v200_v41, %v189_v39 }
  0x72   :  { %1746 = vmatprep.subr.bf16.mxu1 %v1745_v55  ;;  %v223_v45 = vld [vmem:[#allocation5 + $0x4b0] sm:$0xff]  ;;  %v1733_v49 = vpack.c.bf16 %v221_v43, %v210_v42  ;;  %v209_v50 = vld [vmem:[#allocation5 + $0x440] sm:$0xff]  ;;  %v220_v51 = vld [vmem:[#allocation5 + $0x498] sm:$0xff] }
  0x73   :  { %1716 = vmatpush1.bf16.msra.mxu0 %v1715_v61  ;;  %v211_v52 = vld [vmem:[#allocation5 + $0x450] sm:$0xff]  ;;  %v1765_v53 = vpack.c.bf16 %v223_v45, %v212_v44  ;;  %v222_v54 = vld [vmem:[#allocation5 + $0x4a8] sm:$0xff]  ;;  %v232_v55 = vld [vmem:[#allocation5 + $0x4f8] sm:$0xff]  ;;  %v1735_v59 = vpack.c.bf16 %v220_v51, %v209_v50 }
  0x74   :  { %1718 = vmatprep.subr.bf16.mxu0 %v1717_v63  ;;  %v243_v56 = vld [vmem:[#allocation5 + $0x550] sm:$0xff]  ;;  %v234_v57 = vld [vmem:[#allocation5 + $0x508] sm:$0xff]  ;;  %v245_v58 = vld [vmem:[#allocation5 + $0x560] sm:$0xff]  ;;  %v1767_v60 = vpack.c.bf16 %v222_v54, %v211_v52 }
  0x75   :  { %1748 = vmatpush1.bf16.msra.mxu1 %v1747_v62  ;;  %v1737_v61 = vpack.c.bf16 %v243_v56, %v232_v55  ;;  %v231_v62 = vld [vmem:[#allocation5 + $0x4f0] sm:$0xff]  ;;  %v242_v63 = vld [vmem:[#allocation5 + $0x548] sm:$0xff]  ;;  %v233_v1 = vld [vmem:[#allocation5 + $0x500] sm:$0xff]  ;;  %v1769_v2 = vpack.c.bf16 %v245_v58, %v234_v57 }
  0x76   :  { %1750 = vmatprep.subr.bf16.mxu1 %v1749_v4  ;;  %v244_v3 = vld [vmem:[#allocation5 + $0x558] sm:$0xff]  ;;  %v82_v4 = vld [vmem:[#allocation5 + $0x48] sm:$0xff]  ;;  %v93_v5 = vld [vmem:[#allocation5 + $0xa0] sm:$0xff]  ;;  %v1739_v6 = vpack.c.bf16 %v242_v63, %v231_v62 }
  0x77   :  { %1720 = vmatpush1.bf16.msra.mxu0 %v1719_v10  ;;  %v1771_v7 = vpack.c.bf16 %v244_v3, %v233_v1  ;;  %v1773_v8 = vpack.c.bf16 %v93_v5, %v82_v4  ;;  %v81_v9 = vld [vmem:[#allocation5 + $0x40] sm:$0xff]  ;;  %v92_v10 = vld [vmem:[#allocation5 + $0x98] sm:$0xff]  ;;  %v83_v13 = vld [vmem:[#allocation5 + $0x50] sm:$0xff] }
  0x78   :  { %1722 = vmatprep.subr.bf16.mxu0 %v1721_v12  ;;  %v115_v12 = vld [vmem:[#allocation5 + $0x150] sm:$0xff]  ;;  %v94_v14 = vld [vmem:[#allocation5 + $0xa8] sm:$0xff]  ;;  %v1775_v15 = vpack.c.bf16 %v92_v10, %v81_v9  ;;  %v125_v27 = vld [vmem:[#allocation5 + $0x1a0] sm:$0xff] }
  0x79   :  { %1752 = vmatpush1.bf16.msra.mxu1 %v1751_v11  ;;  %v104_v11 = vld [vmem:[#allocation5 + $0xf8] sm:$0xff]  ;;  %v103_v17 = vld [vmem:[#allocation5 + $0xf0] sm:$0xff]  ;;  %v114_v18 = vld [vmem:[#allocation5 + $0x148] sm:$0xff]  ;;  %v1806_v19 = vpack.c.bf16 %v94_v14, %v83_v13 }
  0x7a   :  { %1754 = vmatprep.subr.bf16.mxu1 %v1753_v16  ;;  %v1777_v16 = vpack.c.bf16 %v115_v12, %v104_v11  ;;  %v126_v20 = vld [vmem:[#allocation5 + $0x1a8] sm:$0xff]  ;;  %v1779_v25 = vpack.c.bf16 %v114_v18, %v103_v17  ;;  %v148_v30 = vld [vmem:[#allocation5 + $0x258] sm:$0xff]  ;;  %v159_v31 = vld [vmem:[#allocation5 + $0x2b0] sm:$0xff] }
  0x7b   :  { %1724 = vmatpush1.bf16.msra.mxu0 %v1723_v22  ;;  %v137_v22 = vld [vmem:[#allocation5 + $0x200] sm:$0xff]  ;;  %v127_v32 = vld [vmem:[#allocation5 + $0x1b0] sm:$0xff]  ;;  %v138_v33 = vld [vmem:[#allocation5 + $0x208] sm:$0xff] }
  0x7c   :  { %1726 = vmatprep.subr.bf16.mxu0 %v1725_v24  ;;  %v116_v24 = vld [vmem:[#allocation5 + $0x158] sm:$0xff]  ;;  %v1781_v26 = vpack.c.bf16 %v137_v22, %v126_v20  ;;  %v158_v37 = vld [vmem:[#allocation5 + $0x2a8] sm:$0xff]  ;;  %v1812_v38 = vpack.c.bf16 %v138_v33, %v127_v32  ;;  %v149_v41 = vld [vmem:[#allocation5 + $0x260] sm:$0xff] }
  0x7d   :  { %1756 = vmatpush1.bf16.msra.mxu1 %v1755_v23  ;;  %v105_v23 = vld [vmem:[#allocation5 + $0x100] sm:$0xff]  ;;  %v170_v39 = vld [vmem:[#allocation5 + $0x308] sm:$0xff]  ;;  %v160_v42 = vld [vmem:[#allocation5 + $0x2b8] sm:$0xff] }
  0x7e   :  { %1758 = vmatprep.subr.bf16.mxu1 %v1757_v28  ;;  %v136_v28 = vld [vmem:[#allocation5 + $0x1f8] sm:$0xff]  ;;  %v1809_v29 = vpack.c.bf16 %v116_v24, %v105_v23  ;;  %v169_v45 = vld [vmem:[#allocation5 + $0x300] sm:$0xff]  ;;  %v203_v50 = vld [vmem:[#allocation5 + $0x410] sm:$0xff] }
  0x7f   :  { %1728 = vmatpush1.bf16.msra.mxu0 %v1727_v34  ;;  %v1783_v34 = vpack.c.bf16 %v136_v28, %v125_v27  ;;  %v171_v51 = vld [vmem:[#allocation5 + $0x310] sm:$0xff]  ;;  %v182_v52 = vld [vmem:[#allocation5 + $0x368] sm:$0xff]  ;;  %v213_v1 = vld [vmem:[#allocation5 + $0x460] sm:$0xff] }
  0x80   :  { %1730 = vmatprep.subr.bf16.mxu0 %v1729_v36  ;;  %v147_v36 = vld [vmem:[#allocation5 + $0x250] sm:$0xff]  ;;  %v202_v56 = vld [vmem:[#allocation5 + $0x408] sm:$0xff]  ;;  %v1818_v57 = vpack.c.bf16 %v182_v52, %v171_v51  ;;  %v236_v4 = vld [vmem:[#allocation5 + $0x518] sm:$0xff] }
  0x81   :  { %1760 = vmatpush1.bf16.msra.mxu1 %v1759_v35  ;;  %v1785_v35 = vpack.c.bf16 %v159_v31, %v148_v30  ;;  %v1787_v43 = vpack.c.bf16 %v158_v37, %v147_v36  ;;  %v191_v55 = vld [vmem:[#allocation5 + $0x3b0] sm:$0xff]  ;;  %v214_v58 = vld [vmem:[#allocation5 + $0x468] sm:$0xff]  ;;  %v237_v13 = vld [vmem:[#allocation5 + $0x520] sm:$0xff] }
  0x82   :  { %1762 = vmatprep.subr.bf16.mxu1 %v1761_v40  ;;  %v181_v40 = vld [vmem:[#allocation5 + $0x360] sm:$0xff]  ;;  %v1795_v62 = vpack.c.bf16 %v202_v56, %v191_v55  ;;  %v247_v5 = vld [vmem:[#allocation5 + $0x570] sm:$0xff]  ;;  %v246_v11 = vld [vmem:[#allocation5 + $0x568] sm:$0xff] }
  0x83   :  { %1732 = vmatpush1.bf16.msra.mxu0 %v1731_v46  ;;  %v1789_v44 = vpack.c.bf16 %v181_v40, %v170_v39  ;;  %v180_v46 = vld [vmem:[#allocation5 + $0x358] sm:$0xff]  ;;  %v1801_v9 = vpack.c.bf16 %v247_v5, %v236_v4  ;;  %v235_v10 = vld [vmem:[#allocation5 + $0x510] sm:$0xff]  ;;  %v795_v31 = vld [vmem:[#allocation8 + $0x198] sm:$0xff] }
  0x84   :  { %1734 = vmatprep.subr.bf16.mxu0 %v1733_v49  ;;  %v192_v49 = vld [vmem:[#allocation5 + $0x3b8] sm:$0xff]  ;;  %v792_v17 = vld [vmem:[#allocation8 + $0x180] sm:$0xff]  ;;  %v747_v36 = vld [vmem:[#allocation8 + $0x18] sm:$0xff] }
  0x85   :  { %1764 = vmatpush1.bf16.msra.mxu1 %v1763_v47  ;;  %v1815_v47 = vpack.c.bf16 %v160_v42, %v149_v41  ;;  %v1793_v54 = vpack.c.bf16 %v203_v50, %v192_v49  ;;  %v248_v14 = vld [vmem:[#allocation5 + $0x578] sm:$0xff]  ;;  %v744_v23 = vld [vmem:[#allocation8] sm:$0xff]  ;;  %v779_v39 = vld [vmem:[#allocation8 + $0x118] sm:$0xff] }
  0x86   :  { %1766 = vmatprep.subr.bf16.mxu1 %v1765_v53  ;;  %v1791_v53 = vpack.c.bf16 %v180_v46, %v169_v45  ;;  %v793_v18 = vld [vmem:[#allocation8 + $0x188] sm:$0xff]  ;;  %v1827_v20 = vpack.c.bf16 %v248_v14, %v237_v13  ;;  %v762_v28 = vld [vmem:[#allocation8 + $0x90] sm:$0xff]  ;;  %v764_v40 = vld [vmem:[#allocation8 + $0xa0] sm:$0xff] }
  0x87   :  { %1736 = vmatpush1.bf16.msra.mxu0 %v1735_v59  ;;  %v225_v59 = vld [vmem:[#allocation5 + $0x4c0] sm:$0xff]  ;;  %v745_v24 = vld [vmem:[#allocation8 + $0x8] sm:$0xff]  ;;  %v796_v42 = vld [vmem:[#allocation8 + $0x1a0] sm:$0xff] }
  0x88   :  { %1738 = vmatprep.subr.bf16.mxu0 %v1737_v61  ;;  %v204_v61 = vld [vmem:[#allocation5 + $0x418] sm:$0xff]  ;;  %v1797_v63 = vpack.c.bf16 %v225_v59, %v214_v58  ;;  %v1831_v32 = vpack.c.bf16 %v745_v24, %v744_v23  ;;  %v780_v50 = vld [vmem:[#allocation8 + $0x120] sm:$0xff]  ;;  %v799_v56 = vld [vmem:[#allocation8 + $0x1b8] sm:$0xff] }
  0x89   :  { %1768 = vmatpush1.bf16.msra.mxu1 %v1767_v60  ;;  %v193_v60 = vld [vmem:[#allocation5 + $0x3c0] sm:$0xff]  ;;  %v777_v27 = vld [vmem:[#allocation8 + $0x108] sm:$0xff] }
  0x8a   :  { %1770 = vmatprep.subr.bf16.mxu1 %v1769_v2  ;;  %v224_v2 = vld [vmem:[#allocation5 + $0x4b8] sm:$0xff]  ;;  %v1821_v3 = vpack.c.bf16 %v204_v61, %v193_v60  ;;  %v751_v60 = vld [vmem:[#allocation8 + $0x38] sm:$0xff] }
  0x8b   :  { %1740 = vmatpush1.bf16.msra.mxu0 %v1739_v6  ;;  %v215_v6 = vld [vmem:[#allocation5 + $0x470] sm:$0xff]  ;;  %v794_v30 = vld [vmem:[#allocation8 + $0x190] sm:$0xff]  ;;  %v771_v14 = vld [vmem:[#allocation8 + $0xd8] sm:$0xff] }
  0x8c   :  { %1774 = vmatprep.subr.bf16.mxu0 %v1773_v8  ;;  %v1799_v8 = vpack.c.bf16 %v224_v2, %v213_v1  ;;  %v778_v37 = vld [vmem:[#allocation8 + $0x110] sm:$0xff]  ;;  %v765_v41 = vld [vmem:[#allocation8 + $0xa8] sm:$0xff]  ;;  %v768_v1 = vld [vmem:[#allocation8 + $0xc0] sm:$0xff] }
  0x8d   :  { %1772 = vmatpush1.bf16.msra.mxu1 %v1771_v7  ;;  %v226_v7 = vld [vmem:[#allocation5 + $0x4c8] sm:$0xff]  ;;  %v1867_v45 = vpack.c.bf16 %v779_v39, %v778_v37  ;;  %v1837_v46 = vpack.c.bf16 %v765_v41, %v764_v40  ;;  %v749_v49 = vld [vmem:[#allocation8 + $0x28] sm:$0xff]  ;;  %v798_v55 = vld [vmem:[#allocation8 + $0x1b0] sm:$0xff] }
  0x8e   :  { %1805 = vmatprep.subr.bf16.mxu1 %v2152_v21  ;;  %515 = vmatmul.mubr.f32.vlgmr.msra.gmra.mrb[2].mxu0 %v2235_v48  ;;  %v1824_v12 = vpack.c.bf16 %v226_v7, %v215_v6  ;;  %v781_v52 = vld [vmem:[#allocation8 + $0x128] sm:$0xff]  ;;  %v750_v59 = vld [vmem:[#allocation8 + $0x30] sm:$0xff]  ;;  %v775_v39 = vld [vmem:[#allocation8 + $0xf8] sm:$0xff] }
  0x8f   :  { %1776 = vmatpush1.bf16.msra.mxu0 %v1775_v15  ;;  %656 = vmatprep.mubr.f32.mxu0 %v2151_v0  ;;  %v760_v15 = vld [vmem:[#allocation8 + $0x80] sm:$0xff]  ;;  %v782_v61 = vld [vmem:[#allocation8 + $0x130] sm:$0xff]  ;;  %v769_v2 = vld [vmem:[#allocation8 + $0xc8] sm:$0xff]  ;;  %v1843_v5 = vpack.c.bf16 %v751_v60, %v750_v59 }
  0x90   :  { %586 = vmatmul.mubr.f32.vlgmr.msra.gmra.mrb[2].mxu1 %v2235_v48  ;;  %1778 = vmatprep.subr.bf16.mxu0 %v1777_v16  ;;  %v761_v16 = vld [vmem:[#allocation8 + $0x88] sm:$0xff]  ;;  %v1845_v7 = vpack.c.bf16 %v769_v2, %v768_v1  ;;  %v770_v13 = vld [vmem:[#allocation8 + $0xd0] sm:$0xff] }
  0x91   :  { %1807 = vmatpush3.bf16.msra.mxu1 %v1806_v19  ;;  %1607 = vmatprep.mubr.msk.f32.mxu1 %vm2153_vm0, %v2151_v0  ;;  %v1803_v19 = vpack.c.bf16 %v246_v11, %v235_v10  ;;  %v1829_v22 = vpack.c.bf16 %v761_v16, %v760_v15  ;;  %v801_v4 = vld [vmem:[#allocation8 + $0x1c8] sm:$0xff]  ;;  %v784_v10 = vld [vmem:[#allocation8 + $0x140] sm:$0xff]  ;;  %v802_v15 = vld [vmem:[#allocation8 + $0x1d0] sm:$0xff] }
  0x92   :  { %1808 = vmatprep.subr.bf16.mxu1 %v2152_v21  ;;  %v803_v16 = vld [vmem:[#allocation8 + $0x1d8] sm:$0xff]  ;;  %v786_v23 = vld [vmem:[#allocation8 + $0x150] sm:$0xff]  ;;  %v789_v37 = vld [vmem:[#allocation8 + $0x168] sm:$0xff] }
  0x93   :  { %1780 = vmatpush1.bf16.msra.mxu0 %v1779_v25  ;;  %v776_v25 = vld [vmem:[#allocation8 + $0x100] sm:$0xff]  ;;  %v1881_v24 = vpack.c.bf16 %v803_v16, %v802_v15  ;;  %v806_v41 = vld [vmem:[#allocation8 + $0x1f0] sm:$0xff]  ;;  %v841_v16 = vld [vmem:[#allocation8 + $0x308] sm:$0xff] }
  0x94   :  { %1782 = vmatprep.subr.bf16.mxu0 %v1781_v26  ;;  %v1861_v26 = vpack.c.bf16 %v793_v18, %v792_v17  ;;  %v1863_v33 = vpack.c.bf16 %v777_v27, %v776_v25  ;;  %v787_v25 = vld [vmem:[#allocation8 + $0x158] sm:$0xff]  ;;  %v773_v27 = vld [vmem:[#allocation8 + $0xe8] sm:$0xff] }
  0x95   :  { %1810 = vmatpush3.bf16.msra.mxu1 %v1809_v29  ;;  %v763_v29 = vld [vmem:[#allocation8 + $0x98] sm:$0xff] }
  0x96   :  { %1811 = vmatprep.subr.bf16.mxu1 %v2152_v21 }
  0x97   :  { %1784 = vmatpush1.bf16.msra.mxu0 %v1783_v34  ;;  %v1833_v34 = vpack.c.bf16 %v763_v29, %v762_v28  ;;  %v804_v29 = vld [vmem:[#allocation8 + $0x1e0] sm:$0xff] }
  0x98   :  { %1786 = vmatprep.subr.bf16.mxu0 %v1785_v35  ;;  %v746_v35 = vld [vmem:[#allocation8 + $0x10] sm:$0xff] }
  0x99   :  { %1813 = vmatpush3.bf16.msra.mxu1 %v1812_v38  ;;  %v1865_v38 = vpack.c.bf16 %v795_v31, %v794_v30  ;;  %v805_v30 = vld [vmem:[#allocation8 + $0x1e8] sm:$0xff]  ;;  %v1883_v31 = vpack.c.bf16 %v787_v25, %v786_v23  ;;  %v859_v23 = vld [vmem:[#allocation8 + $0x398] sm:$0xff] }
  0x9a   :  { %1814 = vmatprep.subr.bf16.mxu1 %v2152_v21 }
  0x9b   :  { %1788 = vmatpush1.bf16.msra.mxu0 %v1787_v43  ;;  %v797_v43 = vld [vmem:[#allocation8 + $0x1a8] sm:$0xff] }
  0x9c   :  { %1790 = vmatprep.subr.bf16.mxu0 %v1789_v44  ;;  %v1835_v44 = vpack.c.bf16 %v747_v36, %v746_v35  ;;  %v1869_v51 = vpack.c.bf16 %v797_v43, %v796_v42  ;;  %v788_v35 = vld [vmem:[#allocation8 + $0x160] sm:$0xff]  ;;  %v1885_v36 = vpack.c.bf16 %v805_v30, %v804_v29  ;;  %v807_v42 = vld [vmem:[#allocation8 + $0x1f8] sm:$0xff]  ;;  %v810_v30 = vld [vmem:[#allocation8 + $0x210] sm:$0xff] }
  0x9d   :  { %1816 = vmatpush3.bf16.msra.mxu1 %v1815_v47  ;;  %v748_v47 = vld [vmem:[#allocation8 + $0x20] sm:$0xff]  ;;  %v1887_v43 = vpack.c.bf16 %v789_v37, %v788_v35 }
  0x9e   :  { %1817 = vmatprep.subr.bf16.mxu1 %v2152_v21  ;;  %v828_v35 = vld [vmem:[#allocation8 + $0x2a0] sm:$0xff] }
  0x9f   :  { %1792 = vmatpush1.bf16.msra.mxu0 %v1791_v53  ;;  %v766_v53 = vld [vmem:[#allocation8 + $0xb0] sm:$0xff]  ;;  %v860_v37 = vld [vmem:[#allocation8 + $0x3a0] sm:$0xff] }
  0xa0   :  { %1794 = vmatprep.subr.bf16.mxu0 %v1793_v54  ;;  %v767_v54 = vld [vmem:[#allocation8 + $0xb8] sm:$0xff] }
  0xa1   :  { %1819 = vmatpush3.bf16.msra.mxu1 %v1818_v57  ;;  %v1839_v57 = vpack.c.bf16 %v749_v49, %v748_v47  ;;  %v1841_v58 = vpack.c.bf16 %v767_v54, %v766_v53  ;;  %v790_v47 = vld [vmem:[#allocation8 + $0x170] sm:$0xff]  ;;  %v1889_v49 = vpack.c.bf16 %v807_v42, %v806_v41  ;;  %v856_v54 = vld [vmem:[#allocation8 + $0x380] sm:$0xff] }
  0xa2   :  { %1820 = vmatprep.subr.bf16.mxu1 %v2152_v21  ;;  %v812_v42 = vld [vmem:[#allocation8 + $0x220] sm:$0xff] }
  0xa3   :  { %1796 = vmatpush1.bf16.msra.mxu0 %v1795_v62  ;;  %v1873_v62 = vpack.c.bf16 %v799_v56, %v798_v55  ;;  %v857_v55 = vld [vmem:[#allocation8 + $0x388] sm:$0xff] }
  0xa4   :  { %1798 = vmatprep.subr.bf16.mxu0 %v1797_v63  ;;  %v783_v63 = vld [vmem:[#allocation8 + $0x138] sm:$0xff] }
  0xa5   :  { %1822 = vmatpush3.bf16.msra.mxu1 %v1821_v3  ;;  %v800_v3 = vld [vmem:[#allocation8 + $0x1c0] sm:$0xff]  ;;  %v1875_v6 = vpack.c.bf16 %v783_v63, %v782_v61  ;;  %v2259_v61 = vld [vmem:[#allocation7] sm:$0xff] }
  0xa6   :  { %1823 = vmatprep.subr.bf16.mxu1 %v2152_v21  ;;  %v1877_v11 = vpack.c.bf16 %v801_v4, %v800_v3 }
  0xa7   :  { %1800 = vmatpush1.bf16.msra.mxu0 %v1799_v8  ;;  %v752_v8 = vld [vmem:[#allocation8 + $0x40] sm:$0xff] }
  0xa8   :  { %1802 = vmatprep.subr.bf16.mxu0 %v1801_v9  ;;  %v753_v9 = vld [vmem:[#allocation8 + $0x48] sm:$0xff] }
  0xa9   :  { %1825 = vmatpush3.bf16.msra.mxu1 %v1824_v12  ;;  %v785_v12 = vld [vmem:[#allocation8 + $0x148] sm:$0xff]  ;;  %v1847_v17 = vpack.c.bf16 %v753_v9, %v752_v8 }
  0xaa   :  { %1826 = vmatprep.subr.bf16.mxu1 %v2152_v21  ;;  %v1879_v18 = vpack.c.bf16 %v785_v12, %v784_v10  ;;  %v808_v10 = vld [vmem:[#allocation8 + $0x200] sm:$0xff] }
  0xab   :  { %1804 = vmatpush1.bf16.msra.mxu0 %v1803_v19  ;;  %v1849_v19 = vpack.c.bf16 %v771_v14, %v770_v13  ;;  %v840_v12 = vld [vmem:[#allocation8 + $0x300] sm:$0xff] }
  0xac   :  { %1830 = vmatprep.subr.bf16.mxu0 %v1829_v22  ;;  %v755_v22 = vld [vmem:[#allocation8 + $0x58] sm:$0xff] }
  0xad   :  { %1828 = vmatpush3.bf16.msra.mxu1 %v1827_v20  ;;  %v754_v20 = vld [vmem:[#allocation8 + $0x50] sm:$0xff] }
  0xae   :  { %1862 = vmatprep.subr.bf16.mxu1 %v1861_v26  ;;  %657 = vmatmul.mubr.f32.vlgmr.msra.gmra.mrb[4].mxu0 %v2235_v48  ;;  %v772_v26 = vld [vmem:[#allocation8 + $0xe0] sm:$0xff]  ;;  %v1851_v28 = vpack.c.bf16 %v755_v22, %v754_v20  ;;  %v858_v22 = vld [vmem:[#allocation8 + $0x390] sm:$0xff] }
  0xaf   :  { %1832 = vmatpush3.bf16.msra.mxu0 %v1831_v32  ;;  %v1853_v32 = vpack.c.bf16 %v773_v27, %v772_v26 }
  0xb0   :  { %1608 = vmatmul.mubr.f32.vlgmr.msra.gmra.mrb[4].mxu1 %v2235_v48  ;;  %1834 = vmatprep.subr.bf16.mxu0 %v1833_v34  ;;  %v1871_v48 = vpack.c.bf16 %v781_v52, %v780_v50  ;;  %v757_v34 = vld [vmem:[#allocation8 + $0x68] sm:$0xff]  ;;  %v791_v50 = vld [vmem:[#allocation8 + $0x178] sm:$0xff] }
  0xb1   :  { %1864 = vmatpush3.bf16.msra.mxu1 %v1863_v33  ;;  %v756_v33 = vld [vmem:[#allocation8 + $0x60] sm:$0xff]  ;;  %v825_v52 = vld [vmem:[#allocation8 + $0x288] sm:$0xff]  ;;  %v1891_v56 = vpack.c.bf16 %v791_v50, %v790_v47  ;;  %v830_v47 = vld [vmem:[#allocation8 + $0x2b0] sm:$0xff] }
  0xb2   :  { %1866 = vmatprep.subr.bf16.mxu1 %v1865_v38  ;;  %v774_v38 = vld [vmem:[#allocation8 + $0xf0] sm:$0xff]  ;;  %v1855_v40 = vpack.c.bf16 %v757_v34, %v756_v33  ;;  %v1929_v33 = vpack.c.bf16 %v859_v23, %v858_v22  ;;  %v843_v34 = vld [vmem:[#allocation8 + $0x318] sm:$0xff] }
  0xb3   :  { %1836 = vmatpush3.bf16.msra.mxu0 %v1835_v44  ;;  %v1857_v44 = vpack.c.bf16 %v775_v39, %v774_v38  ;;  %v861_v38 = vld [vmem:[#allocation8 + $0x3a8] sm:$0xff]  ;;  %v862_v50 = vld [vmem:[#allocation8 + $0x3b0] sm:$0xff]  ;;  %v819_v22 = vld [vmem:[#allocation8 + $0x258] sm:$0xff] }
  0xb4   :  { %1838 = vmatprep.subr.bf16.mxu0 %v1837_v46  ;;  %v759_v46 = vld [vmem:[#allocation8 + $0x78] sm:$0xff]  ;;  %v850_v23 = vld [vmem:[#allocation8 + $0x350] sm:$0xff] }
  0xb5   :  { %1868 = vmatpush3.bf16.msra.mxu1 %v1867_v45  ;;  %v758_v45 = vld [vmem:[#allocation8 + $0x70] sm:$0xff] }
  0xb6   :  { %1870 = vmatprep.subr.bf16.mxu1 %v1869_v51  ;;  %v824_v51 = vld [vmem:[#allocation8 + $0x280] sm:$0xff]  ;;  %v1859_v53 = vpack.c.bf16 %v759_v46, %v758_v45  ;;  %v1933_v45 = vpack.c.bf16 %v861_v38, %v860_v37  ;;  %v845_v46 = vld [vmem:[#allocation8 + $0x328] sm:$0xff] }
  0xb7   :  { %1840 = vmatpush3.bf16.msra.mxu0 %v1839_v57  ;;  %v1893_v57 = vpack.c.bf16 %v825_v52, %v824_v51  ;;  %v863_v51 = vld [vmem:[#allocation8 + $0x3b8] sm:$0xff] }
  0xb8   :  { %1842 = vmatprep.subr.bf16.mxu0 %v1841_v58  ;;  %v253_v58 = vlaneseq }
  0xb9   :  { %1872 = vmatpush3.bf16.msra.mxu1 %v1871_v48  ;;  %v1925_v48 = vpack.c.bf16 %v857_v55, %v856_v54  ;;  %v814_v55 = vld [vmem:[#allocation8 + $0x230] sm:$0xff] }
  0xba   :  { %1874 = vmatprep.subr.bf16.mxu1 %v1873_v62  ;;  %v2256_v59 = vshrl.u32 %v253_v58, 7  ;;  %v847_v58 = vld [vmem:[#allocation8 + $0x338] sm:$0xff] }
  0xbb   :  { %1844 = vmatpush3.bf16.msra.mxu0 %v1843_v5 }
  0xbc   :  { %1846 = vmatprep.subr.bf16.mxu0 %v1845_v7  ;;  %v255_v60 = vsub.s32 0, %v2256_v59  ;;  %v259_v62 = vsub.s32 1, %v2256_v59  ;;  %v263_v63 = vsub.s32 2, %v2256_v59  ;;  %v267_v1 = vsub.s32 3, %v2256_v59 }
  0xbd   :  { %1876 = vmatpush3.bf16.msra.mxu1 %v1875_v6  ;;  %v275_v37 = vsub.s32 5, %v2256_v59 }
  0xbe   :  { %1878 = vmatprep.subr.bf16.mxu1 %v1877_v11  ;;  %v256_v2 = vrot.slane %v2259_v61, %v255_v60  ;;  %v260_v3 = vrot.slane %v2259_v61, %v259_v62  ;;  %v264_v4 = vrot.slane %v2259_v61, %v263_v63  ;;  %v268_v5 = vrot.slane %v2259_v61, %v267_v1  ;;  %v809_v11 = vld [vmem:[#allocation8 + $0x208] sm:$0xff]  ;;  %v832_v1 = vld [vmem:[#allocation8 + $0x2c0] sm:$0xff] }
  0xbf   :  { %1848 = vmatpush3.bf16.msra.mxu0 %v1847_v17  ;;  %v826_v17 = vld [vmem:[#allocation8 + $0x290] sm:$0xff]  ;;  %v1895_v26 = vpack.c.bf16 %v809_v11, %v808_v10  ;;  %v848_v10 = vld [vmem:[#allocation8 + $0x340] sm:$0xff] }
  0xc0   :  { %1850 = vmatprep.subr.bf16.mxu0 %v1849_v19 }
  0xc1   :  { %1880 = vmatpush3.bf16.msra.mxu1 %v1879_v18  ;;  %v827_v18 = vld [vmem:[#allocation8 + $0x298] sm:$0xff] }
  0xc2   :  { %1882 = vmatprep.subr.bf16.mxu1 %v1881_v24  ;;  %v1897_v29 = vpack.c.bf16 %v827_v18, %v826_v17 }
  0xc3   :  { %1852 = vmatpush3.bf16.msra.mxu0 %v1851_v28  ;;  %v1927_v28 = vpack.c.bf16 %v841_v16, %v840_v12  ;;  %v849_v12 = vld [vmem:[#allocation8 + $0x348] sm:$0xff]  ;;  %v867_v16 = vld [vmem:[#allocation8 + $0x3d8] sm:$0xff] }
  0xc4   :  { %1854 = vmatprep.subr.bf16.mxu0 %v1853_v32  ;;  %v842_v32 = vld [vmem:[#allocation8 + $0x310] sm:$0xff]  ;;  %v1943_v18 = vpack.c.bf16 %v849_v12, %v848_v10  ;;  %v873_v10 = vld [vmem:[#allocation8 + $0x408] sm:$0xff] }
  0xc5   :  { %1884 = vmatpush3.bf16.msra.mxu1 %v1883_v31  ;;  %v811_v31 = vld [vmem:[#allocation8 + $0x218] sm:$0xff] }
  0xc6   :  { %1886 = vmatprep.subr.bf16.mxu1 %v1885_v36  ;;  %v829_v36 = vld [vmem:[#allocation8 + $0x2a8] sm:$0xff]  ;;  %v1899_v39 = vpack.c.bf16 %v811_v31, %v810_v30 }
  0xc7   :  { %1856 = vmatpush3.bf16.msra.mxu0 %v1855_v40  ;;  %v1931_v40 = vpack.c.bf16 %v843_v34, %v842_v32  ;;  %v1901_v41 = vpack.c.bf16 %v829_v36, %v828_v35  ;;  %v820_v34 = vld [vmem:[#allocation8 + $0x260] sm:$0xff]  ;;  %v821_v35 = vld [vmem:[#allocation8 + $0x268] sm:$0xff] }
  0xc8   :  { %1858 = vmatprep.subr.bf16.mxu0 %v1857_v44  ;;  %v844_v44 = vld [vmem:[#allocation8 + $0x320] sm:$0xff] }
  0xc9   :  { %1888 = vmatpush3.bf16.msra.mxu1 %v1887_v43  ;;  %v813_v43 = vld [vmem:[#allocation8 + $0x228] sm:$0xff]  ;;  %v852_v36 = vld [vmem:[#allocation8 + $0x360] sm:$0xff] }
  0xca   :  { %1890 = vmatprep.subr.bf16.mxu1 %v1889_v49  ;;  %v831_v49 = vld [vmem:[#allocation8 + $0x2b8] sm:$0xff]  ;;  %v1903_v52 = vpack.c.bf16 %v813_v43, %v812_v42  ;;  %v283_v43 = vsub.s32 7, %v2256_v59 }
  0xcb   :  { %1860 = vmatpush3.bf16.msra.mxu0 %v1859_v53  ;;  %v1935_v53 = vpack.c.bf16 %v845_v46, %v844_v44  ;;  %v1905_v54 = vpack.c.bf16 %v831_v49, %v830_v47  ;;  %v839_v42 = vld [vmem:[#allocation8 + $0x2f8] sm:$0xff]  ;;  %v870_v44 = vld [vmem:[#allocation8 + $0x3f0] sm:$0xff]  ;;  %v1919_v46 = vpack.c.bf16 %v821_v35, %v820_v34  ;;  %v876_v34 = vld [vmem:[#allocation8 + $0x420] sm:$0xff] }
  0xcc   :  { %1894 = vmatprep.subr.bf16.mxu0 %v1893_v57  ;;  %v846_v57 = vld [vmem:[#allocation8 + $0x330] sm:$0xff]  ;;  %v877_v35 = vld [vmem:[#allocation8 + $0x428] sm:$0xff] }
  0xcd   :  { %1892 = vmatpush3.bf16.msra.mxu1 %v1891_v56  ;;  %v815_v56 = vld [vmem:[#allocation8 + $0x238] sm:$0xff] }
  0xce   :  { %1926 = vmatprep.subr.bf16.mxu1 %v1925_v48  ;;  %v1937_v48 = vpack.c.bf16 %v863_v51, %v862_v50  ;;  %v822_v51 = vld [vmem:[#allocation8 + $0x270] sm:$0xff] }
 0x141   :  { %v374_v6 = vpop.f32.mrb[0].mxu0 }
 0x142   :  { %v375_v7 = vadd.f32 %v374_v6, %v256_v2  ;;  %v376_v8 = vpop.f32.mrb[1].mxu0  ;;  %v833_v2 = vld [vmem:[#allocation8 + $0x2c8] sm:$0xff]  ;;  %v1939_v6 = vpack.c.bf16 %v847_v58, %v846_v57  ;;  %v855_v57 = vld [vmem:[#allocation8 + $0x378] sm:$0xff] }
 0x143   :  { %v445_v9 = vpop.f32.mrb[0].mxu1  ;;  %v377_v13 = vadd.f32 %v376_v8, %v260_v3  ;;  %v864_v3 = vld [vmem:[#allocation8 + $0x3c0] sm:$0xff]  ;;  %v889_v58 = vld [vmem:[#allocation8 + $0x488] sm:$0xff] }
 0x144   :  { %v446_v14 = vadd.f32 %v445_v9, %v264_v4  ;;  %v447_v15 = vpop.f32.mrb[1].mxu1  ;;  %v733_v19 = vmax.f32 %v375_v7, 0.0  ;;  %v865_v4 = vld [vmem:[#allocation8 + $0x3c8] sm:$0xff]  ;;  %v1909_v7 = vpack.c.bf16 %v833_v2, %v832_v1  ;;  %v816_v8 = vld [vmem:[#allocation8 + $0x240] sm:$0xff]  ;;  %v284_v1 = vrot.slane %v2259_v61, %v283_v43  ;;  %v878_v43 = vld [vmem:[#allocation8 + $0x430] sm:$0xff] }
 0x145   :  { %v448_v20 = vadd.f32 %v447_v15, %v268_v5  ;;  %v734_v24 = vmax.f32 %v377_v13, 0.0  ;;  %v1907_v5 = vpack.c.bf16 %v815_v56, %v814_v55  ;;  %v817_v9 = vld [vmem:[#allocation8 + $0x248] sm:$0xff]  ;;  %v1941_v11 = vpack.c.bf16 %v865_v4, %v864_v3  ;;  %v834_v13 = vld [vmem:[#allocation8 + $0x2d0] sm:$0xff] }
 0x146   :  { %v735_v25 = vmax.f32 %v446_v14, 0.0  ;;  %v835_v14 = vld [vmem:[#allocation8 + $0x2d8] sm:$0xff]  ;;  %v866_v15 = vld [vmem:[#allocation8 + $0x3d0] sm:$0xff]  ;;  %v1911_v17 = vpack.c.bf16 %v817_v9, %v816_v8  ;;  %v872_v9 = vld [vmem:[#allocation8 + $0x400] sm:$0xff] }
 0x147   :  { %v736_v27 = vmax.f32 %v448_v20, 0.0  ;;  %991 = vmatprep.mubr.f32.mxu0 %v734_v24  ;;  %v818_v20 = vld [vmem:[#allocation8 + $0x250] sm:$0xff]  ;;  %v1945_v24 = vpack.c.bf16 %v867_v16, %v866_v15  ;;  %v891_v15 = vld [vmem:[#allocation8 + $0x498] sm:$0xff]  ;;  %v904_v16 = vld [vmem:[#allocation8 + $0x500] sm:$0xff] }
 0x148   :  { %992 = vmatmul.mubr.f32.vlgmr.msra.gmra.mrb[6].mxu0 %v733_v19  ;;  %v1913_v19 = vpack.c.bf16 %v835_v14, %v834_v13  ;;  %v1915_v30 = vpack.c.bf16 %v819_v22, %v818_v20  ;;  %v1959_v22 = vpack.c.bf16 %v873_v10, %v872_v9  ;;  %v250_v10 = vld [vmem:[#allocation7 + $0x8] sm:$0x7] }
 0x149   :  { %1061 = vmatprep.mubr.f32.mxu1 %v736_v27  ;;  %1896 = vmatpush3.bf16.msra.mxu0 %v1895_v26  ;;  %v836_v26 = vld [vmem:[#allocation8 + $0x2e0] sm:$0xff]  ;;  %v837_v27 = vld [vmem:[#allocation8 + $0x2e8] sm:$0xff] }
 0x14a   :  { %1062 = vmatmul.mubr.f32.vlgmr.msra.gmra.mrb[6].mxu1 %v735_v25  ;;  %1898 = vmatprep.subr.bf16.mxu0 %v1897_v29  ;;  %v851_v25 = vld [vmem:[#allocation8 + $0x358] sm:$0xff]  ;;  %v869_v29 = vld [vmem:[#allocation8 + $0x3e8] sm:$0xff]  ;;  %v1917_v32 = vpack.c.bf16 %v837_v27, %v836_v26 }
 0x14b   :  { %1928 = vmatpush3.bf16.msra.mxu1 %v1927_v28  ;;  %v868_v28 = vld [vmem:[#allocation8 + $0x3e0] sm:$0xff]  ;;  %v1947_v31 = vpack.c.bf16 %v851_v25, %v850_v23  ;;  %v874_v25 = vld [vmem:[#allocation8 + $0x410] sm:$0xff]  ;;  %v875_v26 = vld [vmem:[#allocation8 + $0x418] sm:$0xff] }
 0x14c   :  { %1930 = vmatprep.subr.bf16.mxu1 %v1929_v33  ;;  %v271_v33 = vsub.s32 4, %v2256_v59  ;;  %v1949_v38 = vpack.c.bf16 %v869_v29, %v868_v28  ;;  %v892_v28 = vld [vmem:[#allocation8 + $0x4a0] sm:$0xff]  ;;  %v893_v29 = vld [vmem:[#allocation8 + $0x4a8] sm:$0xff] }
 0x14d   :  { %1900 = vmatpush3.bf16.msra.mxu0 %v1899_v39  ;;  %v279_v39 = vsub.s32 6, %v2256_v59 }
 0x14e   :  { %1902 = vmatprep.subr.bf16.mxu0 %v1901_v41  ;;  %v838_v41 = vld [vmem:[#allocation8 + $0x2f0] sm:$0xff]  ;;  %v272_v47 = vrot.slane %v2259_v61, %v271_v33  ;;  %v1965_v33 = vpack.c.bf16 %v893_v29, %v892_v28  ;;  %v919_v28 = vld [vmem:[#allocation8 + $0x578] sm:$0xff] }
 0x14f   :  { %1932 = vmatpush3.bf16.msra.mxu1 %v1931_v40  ;;  %v853_v40 = vld [vmem:[#allocation8 + $0x368] sm:$0xff]  ;;  %v1921_v50 = vpack.c.bf16 %v839_v42, %v838_v41  ;;  %v280_v55 = vrot.slane %v2259_v61, %v279_v39  ;;  %v908_v39 = vld [vmem:[#allocation8 + $0x520] sm:$0xff]  ;;  %v1967_v41 = vpack.c.bf16 %v877_v35, %v876_v34 }
 0x150   :  { %1934 = vmatprep.subr.bf16.mxu1 %v1933_v45  ;;  %v871_v45 = vld [vmem:[#allocation8 + $0x3f8] sm:$0xff]  ;;  %v1951_v49 = vpack.c.bf16 %v853_v40, %v852_v36  ;;  %v909_v40 = vld [vmem:[#allocation8 + $0x528] sm:$0xff] }
 0x151   :  { %1904 = vmatpush3.bf16.msra.mxu0 %v1903_v52  ;;  %v823_v52 = vld [vmem:[#allocation8 + $0x278] sm:$0xff]  ;;  %v1953_v56 = vpack.c.bf16 %v871_v45, %v870_v44  ;;  %v1996_v45 = vpack.c.bf16 %v909_v40, %v908_v39 }
 0x152   :  { %1906 = vmatprep.subr.bf16.mxu0 %v1905_v54  ;;  %v276_v54 = vrot.slane %v2259_v61, %v275_v37  ;;  %v1923_v3 = vpack.c.bf16 %v823_v52, %v822_v51  ;;  %v905_v61 = vld [vmem:[#allocation8 + $0x508] sm:$0xff]  ;;  %v894_v37 = vld [vmem:[#allocation8 + $0x4b0] sm:$0xff]  ;;  %v879_v44 = vld [vmem:[#allocation8 + $0x438] sm:$0xff] }
 0x153   :  { %1936 = vmatpush3.bf16.msra.mxu1 %v1935_v53  ;;  %v854_v53 = vld [vmem:[#allocation8 + $0x370] sm:$0xff]  ;;  %v1990_v27 = vpack.c.bf16 %v905_v61, %v904_v16  ;;  %v1971_v51 = vpack.c.bf16 %v879_v44, %v878_v43  ;;  %v903_v16 = vld [vmem:[#allocation8 + $0x4f8] sm:$0xff]  ;;  %v916_v61 = vld [vmem:[#allocation8 + $0x560] sm:$0xff] }
 0x154   :  { %1938 = vmatprep.subr.bf16.mxu1 %v1937_v48  ;;  %v888_v48 = vld [vmem:[#allocation8 + $0x480] sm:$0xff] }
 0x155   :  { %1908 = vmatpush3.bf16.msra.mxu0 %v1907_v5  ;;  %v1957_v8 = vpack.c.bf16 %v889_v58, %v888_v48  ;;  %v913_v48 = vld [vmem:[#allocation8 + $0x548] sm:$0xff] }
 0x156   :  { %1910 = vmatprep.subr.bf16.mxu0 %v1909_v7  ;;  %v1955_v7 = vpack.c.bf16 %v855_v57, %v854_v53  ;;  %v881_v53 = vld [vmem:[#allocation8 + $0x448] sm:$0xff]  ;;  %v912_v57 = vld [vmem:[#allocation8 + $0x540] sm:$0xff] }
 0x157   :  { %1940 = vmatpush3.bf16.msra.mxu1 %v1939_v6 }
 0x158   :  { %1942 = vmatprep.subr.bf16.mxu1 %v1941_v11  ;;  %v890_v11 = vld [vmem:[#allocation8 + $0x490] sm:$0xff] }
 0x159   :  { %1912 = vmatpush3.bf16.msra.mxu0 %v1911_v17 }
 0x15a   :  { %1914 = vmatprep.subr.bf16.mxu0 %v1913_v19 }
 0x15b   :  { %1944 = vmatpush3.bf16.msra.mxu1 %v1943_v18 }
 0x15c   :  { %1946 = vmatprep.subr.bf16.mxu1 %v1945_v24  ;;  %v1961_v24 = vpack.c.bf16 %v891_v15, %v890_v11  ;;  %v902_v15 = vld [vmem:[#allocation8 + $0x4f0] sm:$0xff] }
 0x15d   :  { %1916 = vmatpush3.bf16.msra.mxu0 %v1915_v30  ;;  %v906_v30 = vld [vmem:[#allocation8 + $0x510] sm:$0xff] }
 0x15e   :  { %1918 = vmatprep.subr.bf16.mxu0 %v1917_v32  ;;  %v1963_v32 = vpack.c.bf16 %v875_v26, %v874_v25  ;;  %v292_v25 = vrot.slane %v250_v10, %v259_v62  ;;  %v296_v26 = vrot.slane %v250_v10, %v263_v63 }
 0x15f   :  { %1948 = vmatpush3.bf16.msra.mxu1 %v1947_v31  ;;  %v907_v31 = vld [vmem:[#allocation8 + $0x518] sm:$0xff] }
 0x160   :  { %1950 = vmatprep.subr.bf16.mxu1 %v1949_v38  ;;  %v1993_v36 = vpack.c.bf16 %v907_v31, %v906_v30  ;;  %v895_v38 = vld [vmem:[#allocation8 + $0x4b8] sm:$0xff] }
 0x161   :  { %v516_v2 = vpop.f32.mrb[2].mxu0  ;;  %1920 = vmatpush3.bf16.msra.mxu0 %v1919_v46  ;;  %v1969_v42 = vpack.c.bf16 %v895_v38, %v894_v37  ;;  %v896_v46 = vld [vmem:[#allocation8 + $0x4c0] sm:$0xff]  ;;  %v1365_v38 = vld [vmem:[%s2317_s4] ss:$0 sm:$0xff]  ;;  %s2154_s4 = smov [#allocation10]  }
 0x162   :  { %v517_v4 = vadd.f32 %v516_v2, %v272_v47  ;;  %v518_v5 = vpop.f32.mrb[3].mxu0  ;;  %1922 = vmatprep.subr.bf16.mxu0 %v1921_v50  ;;  %v897_v47 = vld [vmem:[#allocation8 + $0x4c8] sm:$0xff]  ;;  %v911_v50 = vld [vmem:[#allocation8 + $0x538] sm:$0xff]  ;;  %v882_v2 = vld [vmem:[#allocation8 + $0x450] sm:$0xff]  ;;  %s1354_s18 = sshll.u32 %s2154_s4, 4  ;;  %s1355_s18 = int_to_ptr.vmem [resolvable:$true] %s1354_s18 }
 0x163   :  { %v587_v6 = vpop.f32.mrb[2].mxu1  ;;  %1952 = vmatpush3.bf16.msra.mxu1 %v1951_v49  ;;  %v519_v12 = vadd.f32 %v518_v5, %v276_v54  ;;  %v910_v49 = vld [vmem:[#allocation8 + $0x530] sm:$0xff]  ;;  %v1973_v52 = vpack.c.bf16 %v897_v47, %v896_v46  ;;  %v900_v5 = vld [vmem:[#allocation8 + $0x4e0] sm:$0xff]  ;;  %s2113_s19 = scalar_lea.vmem %s1355_s18, 32  ;;  %p2118_p5 = scmp.lt.s32.totalorder %s1355_s18, %s1355_s18 }
 0x164   :  { %v588_v13 = vadd.f32 %v587_v6, %v280_v55  ;;  %v589_v14 = vpop.f32.mrb[3].mxu1  ;;  %1954 = vmatprep.subr.bf16.mxu1 %v1953_v56  ;;  %v737_v17 = vmax.f32 %v517_v4, 0.0  ;;  %v1999_v54 = vpack.c.bf16 %v911_v50, %v910_v49  ;;  %v898_v55 = vld [vmem:[#allocation8 + $0x4d0] sm:$0xff]  ;;  %v899_v56 = vld [vmem:[#allocation8 + $0x4d8] sm:$0xff]  ;;  %v2002_v4 = vpack.c.bf16 %v913_v48, %v912_v57  ;;  %v901_v6 = vld [vmem:[#allocation8 + $0x4e8] sm:$0xff]  ;;  %p2114_p4 = scmp.ne.s32.totalorder %s1355_s18, %s2113_s19  ;;  %p2119_p6 = scmp.lt.s32.totalorder %s2113_s19, %s2113_s19 }
 0x165   :  { %v590_v18 = vadd.f32 %v589_v14, %v284_v1  ;;  %v738_v19 = vmax.f32 %v519_v12, 0.0  ;;  %1924 = vmatpush3.bf16.msra.mxu0 %v1923_v3  ;;  %v1977_v1 = vpack.c.bf16 %v899_v56, %v898_v55  ;;  %v883_v3 = vld [vmem:[#allocation8 + $0x458] sm:$0xff]  ;;  %v1981_v11 = vpack.c.bf16 %v901_v6, %v900_v5  ;;  %v884_v12 = vld [vmem:[#allocation8 + $0x460] sm:$0xff] }
 0x166   :  { %v739_v20 = vmax.f32 %v588_v13, 0.0  ;;  %1958 = vmatprep.subr.bf16.mxu0 %v1957_v8  ;;  %v915_v8 = vld [vmem:[#allocation8 + $0x558] sm:$0xff]  ;;  %v1979_v9 = vpack.c.bf16 %v883_v3, %v882_v2  ;;  %v885_v13 = vld [vmem:[#allocation8 + $0x468] sm:$0xff]  ;;  %p2120_p7 = por %p2119_p6, %p2118_p5 }
 0x167   :  { %v740_v23 = vmax.f32 %v590_v18, 0.0  ;;  %1956 = vmatpush3.bf16.msra.mxu1 %v1955_v7  ;;  %1131 = vmatprep.mubr.f32.mxu0 %v738_v19  ;;  %v914_v7 = vld [vmem:[#allocation8 + $0x550] sm:$0xff]  ;;  %v1983_v18 = vpack.c.bf16 %v885_v13, %v884_v12  ;;  %v288_v19 = vrot.slane %v250_v10, %v255_v60 }
 0x168   :  { %1989 = vmatprep.subr.bf16.mxu1 %v2152_v21  ;;  %1132 = vmatmul.mubr.f32.vlgmr.msra.gmra.mrb[8].mxu0 %v737_v17  ;;  %v2005_v14 = vpack.c.bf16 %v915_v8, %v914_v7  ;;  %v917_v17 = vld [vmem:[#allocation8 + $0x568] sm:$0xff]  ;;  %p2121_p8 = pnand %p2120_p7, %p2114_p4 }
 0x169   :  { %1201 = vmatprep.mubr.f32.mxu1 %v740_v23  ;;  %1960 = vmatpush3.bf16.msra.mxu0 %v1959_v22  ;;  %v886_v22 = vld [vmem:[#allocation8 + $0x470] sm:$0xff]  ;;  %v887_v23 = vld [vmem:[#allocation8 + $0x478] sm:$0xff] }
 0x16a   :  { %1202 = vmatmul.mubr.f32.vlgmr.msra.gmra.mrb[8].mxu1 %v739_v20  ;;  %1962 = vmatprep.subr.bf16.mxu0 %v1961_v24  ;;  %v1985_v20 = vpack.c.bf16 %v903_v16, %v902_v15  ;;  %v2008_v24 = vpack.c.bf16 %v917_v17, %v916_v61  ;;  %v1987_v30 = vpack.c.bf16 %v887_v23, %v886_v22 }
 0x16b   :  { %1991 = vmatpush3.bf16.msra.mxu1 %v1990_v27  ;;  %1642 = vmatprep.mubr.msk.f32.mxu1 %vm2153_vm0, %v2151_v0  ;;  %v880_v0 = vld [vmem:[#allocation8 + $0x440] sm:$0xff]  ;;  %v918_v27 = vld [vmem:[#allocation8 + $0x570] sm:$0xff] }
 0x16c   :  { %1992 = vmatprep.subr.bf16.mxu1 %v2152_v21  ;;  %v1975_v58 = vpack.c.bf16 %v881_v53, %v880_v0 }
 0x16d   :  { %1964 = vmatpush3.bf16.msra.mxu0 %v1963_v32 }
 0x16e   :  { %1966 = vmatprep.subr.bf16.mxu0 %v1965_v33  ;;  %v2011_v33 = vpack.c.bf16 %v919_v28, %v918_v27 }
 0x16f   :  { %1994 = vmatpush3.bf16.msra.mxu1 %v1993_v36 }
 0x170   :  { %1995 = vmatprep.subr.bf16.mxu1 %v2152_v21 }
 0x171   :  { %1968 = vmatpush3.bf16.msra.mxu0 %v1967_v41 }
 0x172   :  { %1970 = vmatprep.subr.bf16.mxu0 %v1969_v42 }
 0x173   :  { %1997 = vmatpush3.bf16.msra.mxu1 %v1996_v45 }
 0x174   :  { %1998 = vmatprep.subr.bf16.mxu1 %v2152_v21 }
 0x175   :  { %1972 = vmatpush3.bf16.msra.mxu0 %v1971_v51 }
 0x176   :  { %1974 = vmatprep.subr.bf16.mxu0 %v1973_v52 }
 0x177   :  { %2000 = vmatpush3.bf16.msra.mxu1 %v1999_v54 }
 0x178   :  { %2001 = vmatprep.subr.bf16.mxu1 %v2152_v21 }
 0x179   :  { %1976 = vmatpush3.bf16.msra.mxu0 %v1975_v58 }
 0x17a   :  { %1978 = vmatprep.subr.bf16.mxu0 %v1977_v1 }
 0x17b   :  { %2003 = vmatpush3.bf16.msra.mxu1 %v2002_v4 }
 0x17c   :  { %2004 = vmatprep.subr.bf16.mxu1 %v2152_v21 }
 0x17d   :  { %1980 = vmatpush3.bf16.msra.mxu0 %v1979_v9 }
 0x17e   :  { %1982 = vmatprep.subr.bf16.mxu0 %v1981_v11 }
 0x17f   :  { %2006 = vmatpush3.bf16.msra.mxu1 %v2005_v14 }
 0x180   :  { %2007 = vmatprep.subr.bf16.mxu1 %v2152_v21 }
 0x181   :  { %v658_v29 = vpop.f32.mrb[4].mxu0  ;;  %1984 = vmatpush3.bf16.msra.mxu0 %v1983_v18 }
 0x182   :  { %v659_v31 = vadd.f32 %v658_v29, %v288_v19  ;;  %v660_v60 = vpop.f32.mrb[5].mxu0  ;;  %1986 = vmatprep.subr.bf16.mxu0 %v1985_v20 }
 0x183   :  { %2009 = vmatpush3.bf16.msra.mxu1 %v2008_v24  ;;  %v729_v32 = vpop.f32.mrb[4].mxu1  ;;  %v661_v34 = vadd.f32 %v660_v60, %v292_v25 }
 0x184   :  { %v730_v35 = vadd.f32 %v729_v32, %v296_v26  ;;  %v1609_v36 = vpop.f32.mrb[5].mxu1  ;;  %2010 = vmatprep.subr.bf16.mxu1 %v2152_v21  ;;  %v741_v63 = vmax.f32 %v659_v31, 0.0 }
 0x185   :  { %v742_v62 = vmax.f32 %v661_v34, 0.0  ;;  %1988 = vmatpush3.bf16.msra.mxu0 %v1987_v30 }
 0x186   :  { %v743_v59 = vmax.f32 %v730_v35, 0.0 }
 0x187   :  { %2012 = vmatpush3.bf16.msra.mxu1 %v2011_v33  ;;  %1271 = vmatprep.mubr.f32.mxu0 %v742_v62 }
 0x188   :  { %1272 = vmatmul.mubr.f32.vlgmr.msra.gmra.mrb[10].mxu0 %v741_v63 }
 0x18a   :  { %1643 = vmatmul.mubr.f32.vlgmr.msra.gmra.mrb[10].mxu1 %v743_v59 }
 0x21b   :  { %v1415_v37 = vpop.f32.mrb[6].mxu0 }
 0x21c   :  { %v1416_v39 = vpop.f32.mrb[7].mxu0 }
 0x21d   :  { %v1450_v40 = vpop.f32.mrb[6].mxu1  ;;  %v1417_v41 = vadd.f32 %v1416_v39, %v1415_v37 }
 0x21e   :  { %v1451_v42 = vpop.f32.mrb[7].mxu1 }
 0x21f   :  { %v1452_v43 = vadd.f32 %v1451_v42, %v1450_v40  ;;  %v994_v44 = vadd.f32 %v1417_v41, %v1365_v38 }
 0x221   :  { %v1064_v21 = vadd.f32 %v1452_v43, %v994_v44 }
 0x23b   :  { %v1485_v45 = vpop.f32.mrb[8].mxu0 }
 0x23c   :  { %v1486_v46 = vpop.f32.mrb[9].mxu0 }
 0x23d   :  { %v1520_v47 = vpop.f32.mrb[8].mxu1  ;;  %v1487_v49 = vadd.f32 %v1486_v46, %v1485_v45 }
 0x23e   :  { %v1521_v50 = vpop.f32.mrb[9].mxu1 }
 0x23f   :  { %v1522_v51 = vadd.f32 %v1521_v50, %v1520_v47  ;;  %v1134_v52 = vadd.f32 %v1487_v49, %v1064_v21 }
 0x241   :  { %v1204_v0 = vadd.f32 %v1522_v51, %v1134_v52 }
 0x25b   :  { %v1555_v53 = vpop.f32.mrb[10].mxu0 }
 0x25c   :  { %v1556_v54 = vpop.f32.mrb[11].mxu0 }
 0x25d   :  { %v1343_v55 = vpop.f32.mrb[10].mxu1  ;;  %v1557_v56 = vadd.f32 %v1556_v54, %v1555_v53 }
 0x25e   :  { %v1644_v57 = vpop.f32.mrb[11].mxu1 }
 0x25f   :  { %v1274_v48 = vadd.f32 %v1557_v56, %v1204_v0 }
 0x261   :  { %v1344_v58 = vadd.f32 %v1343_v55, %v1274_v48 }
 0x263   :  { %1347 = vst [vmem:[#allocation10] sm:$0x3] %v1344_v58 }
 0x264   :  { %2124 = shalt.err (!%p2121_p8)
}
 0x265   :  { %s2125_s22 = scalar_lea.hbm %s2318_s5, 32 }
 0x266   :  { %p2126_p9 = scmp.ne.s32.totalorder %s2318_s5, %s2125_s22  ;;  %p2129_p10 = scmp.lt.u32.totalorder %s2125_s22, %s2318_s5 }
 0x268   :  { %p2131_p11 = pnand %p2129_p10, %p2126_p9 }
 0x26a   :  { %2134 = shalt.err (!%p2131_p11)
}
 0x26b   :  { %1357 = dma.vmem_to_hbm [thread:$0]  %s1355_s18, 32, %s2318_s5, [#allocation4]  }
 0x26c   :  { %2141 = dma.done.wait [#allocation4], 32  }
 0x26d   :  { %2142 = vsyncadd [#allocation4], 4294967264 }
 0x26e   :  { %1361 = vsyncpa [#allocation3], 1 }
 0x26f   :  { %1362 = vsyncpa [#allocation6], 1 }
 0x270   :  { %1363 = vsyncpa [#allocation9], 1 }
 0x271   :  { %1364 = vsyncpa [#allocation4], 1 }

</bundles_post_ra>
